<compile_context>
chip_gen: v7x
topology: tpu7x:2x2x1
jax: 0.10.0
libtpu: 0.0.40
codegen_flags: <defaults>
</compile_context>

<pallas_src>
import functools

import jax
import jax.numpy as jnp
from jax.experimental import pallas as pl
from jax.experimental.pallas import tpu as pltpu

LOW_RES = 336                    # min(42 * 2**3, 336)
CHANNELS = [336, 168, 84, 42]    # per-layer in/out channels
EPS = 1e-5                       # BatchNorm1d default eps
PRELU_INIT = 0.25                # PReLU default init
MXU_DTYPE = jnp.bfloat16         # matmul-input dtype (accumulation stays f32)


def upsampler_kernel(zb_ref, wd_ref,
                     w10_ref, w11_ref, g1_ref, b1_ref, a1_ref,
                     w20_ref, w21_ref, g2_ref, b2_ref, a2_ref,
                     w30_ref, w31_ref, g3_ref, b3_ref, a3_ref,
                     out_ref, *, eps):
    # Dense (+ bias, folded into wd via the augmented 1-column of zb):
    # (B*L8, L8*(n_z+1)) @ (L8*(n_z+1), 336) -> (B*L8, 336); rows = (batch, pos).
    x = jnp.dot(zb_ref[...], wd_ref[...], preferred_element_type=jnp.float32)

    def upsample_block(x, w0_ref, w1_ref, g_ref, b_ref, a_ref):
        # ConvTranspose1d(k=2, s=2): one dense matmul per kernel tap; stack the
        # two tap outputs on rows (tap k feeds output positions 2p + k).
        xh = x.astype(MXU_DTYPE)
        y0 = jnp.dot(xh, w0_ref[...], preferred_element_type=jnp.float32)
        y1 = jnp.dot(xh, w1_ref[...], preferred_element_type=jnp.float32)
        y = jnp.concatenate([y0, y1], axis=0)                # (B*L_out, Cout) f32

        # BatchNorm1d, training mode (batch statistics, biased variance):
        # per-channel stats = plain reduction over rows (all batch x positions).
        inv_n = 1.0 / y.shape[0]
        mean = jnp.sum(y, axis=0, keepdims=True) * inv_n      # (1, Cout)
        d = y - mean
        var = jnp.sum(d * d, axis=0, keepdims=True) * inv_n   # two-pass variance
        scale = g_ref[...] * jax.lax.rsqrt(var + eps)
        yb = d * scale + b_ref[...]

        alpha = a_ref[0]                                      # PReLU slope (SMEM)
        return jnp.where(yb >= 0.0, yb, alpha * yb)

    x = upsample_block(x, w10_ref, w11_ref, g1_ref, b1_ref, a1_ref)
    x = upsample_block(x, w20_ref, w21_ref, g2_ref, b2_ref, a2_ref)
    x = upsample_block(x, w30_ref, w31_ref, g3_ref, b3_ref, a3_ref)
    out_ref[...] = x        # (B*n_l, 42); rows ordered (k3, k2, k1, batch, l0)


def upsampler_forward_pallas(z, params, n_l):
    B, n_z = z.shape
    L8 = n_l // 8
    nzp = n_z + 1
    c_out = CHANNELS[-1]

    # --- Dense: block-diagonal packing of z (+1 column for the bias) over the
    # L8 position groups, so weight + bias + all groups fuse into one matmul
    # whose output is already group-on-rows (row index = b*L8 + l).
    z_aug = jnp.concatenate([z, jnp.ones((B, 1), z.dtype)], axis=1)       # (B, n_z+1)
    z_big = (z_aug[:, None, None, :] *
             jnp.eye(L8, dtype=z.dtype)[None, :, :, None]).reshape(B * L8, L8 * nzp)

    # Wd columns are ordered c*L8 + l (PyTorch reshape (B, 336, L8)); repack so
    # group l's weight block Wd_big[l*(n_z+1):(l+1)*(n_z+1), :] maps z_aug -> 336.
    Wd, bd = params["Wd"], params["bd"]
    Wd_aug = jnp.concatenate([Wd, bd[None, :]], axis=0)                   # (n_z+1, L8*336)
    Wd_big = (Wd_aug.reshape(nzp, LOW_RES, L8)
              .transpose(2, 0, 1).reshape(L8 * nzp, LOW_RES))

    args = [z_big.astype(MXU_DTYPE), Wd_big.astype(MXU_DTYPE)]
    flops = 2 * (B * L8) * (L8 * nzp) * LOW_RES
    transcendentals = 0
    rows = B * L8
    for (W, gamma, beta, alpha) in params["layers"]:
        cin, cout, _ = W.shape
        args += [W[:, :, 0].astype(MXU_DTYPE),               # tap 0 -> positions 2p
                 W[:, :, 1].astype(MXU_DTYPE),               # tap 1 -> positions 2p+1
                 gamma.reshape(1, cout).astype(jnp.float32),
                 beta.reshape(1, cout).astype(jnp.float32),
                 jnp.asarray(alpha, jnp.float32).reshape(1)]
        flops += 2 * 2 * rows * cin * cout                   # two taps per layer
        transcendentals += cout                               # rsqrt per channel
        rows *= 2

    vmem = pl.BlockSpec(memory_space=pltpu.MemorySpace.VMEM)
    smem = pl.BlockSpec(memory_space=pltpu.MemorySpace.SMEM)
    in_specs = [vmem, vmem] + [vmem, vmem, vmem, vmem, smem] * 3

    bytes_accessed = (sum(int(a.size) * a.dtype.itemsize for a in args)
                      + B * n_l * c_out * 4)

    flat = pl.pallas_call(
        functools.partial(upsampler_kernel, eps=EPS),
        out_shape=jax.ShapeDtypeStruct((B * n_l, c_out), jnp.float32),
        in_specs=in_specs,
        out_specs=vmem,
        cost_estimate=pl.CostEstimate(flops=flops,
                                      transcendentals=transcendentals,
                                      bytes_accessed=bytes_accessed),
    )(*args)

    # Row ordering after the three tap-concats: (k3, k2, k1, b, l0); the sequence
    # position is p = 8*l0 + 4*k1 + 2*k2 + k3.  Unpack to PyTorch NCL (B, 42, n_l)
    # in plain JAX (free glue).
    out6 = flat.reshape(2, 2, 2, B, L8, c_out)
    return jnp.transpose(out6, (3, 5, 4, 2, 1, 0)).reshape(B, c_out, n_l)


def reference_forward(z, params, n_l):
    """Pure-JAX f32 reference, mirroring the PyTorch forward (train-mode BN)."""
    B = z.shape[0]
    L8 = n_l // 8
    h = z @ params["Wd"] + params["bd"]
    x = h.reshape(B, LOW_RES, L8)
    L = L8
    for (W, gamma, beta, alpha) in params["layers"]:
        cout = W.shape[1]
        y = jnp.einsum('bcl,cok->bolk', x, W).reshape(B, cout, 2 * L)
        mean = jnp.mean(y, axis=(0, 2), keepdims=True)
        var = jnp.mean(jnp.square(y - mean), axis=(0, 2), keepdims=True)
        yn = (y - mean) / jnp.sqrt(var + EPS)
        yb = yn * gamma[None, :, None] + beta[None, :, None]
        x = jnp.where(yb >= 0.0, yb, alpha * yb)
        L *= 2
    return x


def init_params(key, n_z, n_l):
    """Deterministic synthetic parameters with the module's shapes."""
    L8 = n_l // 8
    D = L8 * LOW_RES
    ks = jax.random.split(key, 2 + 3 * 3)
    Wd = 0.05 * jax.random.normal(ks[0], (n_z, D), jnp.float32)   # Linear (in x out)
    bd = 0.05 * jax.random.normal(ks[1], (D,), jnp.float32)
    layers = []
    for i in range(3):
        cin, cout = CHANNELS[i], CHANNELS[i + 1]
        kw, kg, kb = ks[2 + 3 * i], ks[3 + 3 * i], ks[4 + 3 * i]
        W = 0.05 * jax.random.normal(kw, (cin, cout, 2), jnp.float32)  # ConvTranspose1d layout
        gamma = 1.0 + 0.1 * jax.random.normal(kg, (cout,), jnp.float32)
        beta = 0.1 * jax.random.normal(kb, (cout,), jnp.float32)
        layers.append((W, gamma, beta, PRELU_INIT))
    return {"Wd": Wd, "bd": bd, "layers": layers}


if __name__ == "__main__":
    # B=16 (per review: amortize constants over more MXU rows); n_l multiple of 8.
    B, n_z, n_l = 16, 32, 16
    key = jax.random.PRNGKey(0)
    kz, kp = jax.random.split(key)
    z = jax.random.normal(kz, (B, n_z), jnp.float32)
    params = init_params(kp, n_z, n_l)

    out = jax.block_until_ready(upsampler_forward_pallas(z, params, n_l))
    ref = reference_forward(z, params, n_l)

    assert out.shape == (B, CHANNELS[-1], n_l), out.shape
    # Tolerance sized for bf16 MXU inputs (f32 accumulation, f32 BN/PReLU math)
    # vs the pure-f32 reference through 3 chained conv+BN layers.
    err = float(jnp.max(jnp.abs(out - ref)))
    assert jnp.allclose(out, ref, atol=3e-2, rtol=3e-2), err
    print("KERNEL_OK")
</pallas_src>

<mosaic_0001>
module attributes {stable_mosaic.version = 11 : i64} {
  func.func @upsampler_kernel(%arg0: memref<32x66xbf16, #tpu.memory_space<vmem>>, %arg1: memref<66x336xbf16, #tpu.memory_space<vmem>>, %arg2: memref<336x168xbf16, #tpu.memory_space<vmem>>, %arg3: memref<336x168xbf16, #tpu.memory_space<vmem>>, %arg4: memref<1x168xf32, #tpu.memory_space<vmem>>, %arg5: memref<1x168xf32, #tpu.memory_space<vmem>>, %arg6: memref<1xf32, #tpu.memory_space<smem>>, %arg7: memref<168x84xbf16, #tpu.memory_space<vmem>>, %arg8: memref<168x84xbf16, #tpu.memory_space<vmem>>, %arg9: memref<1x84xf32, #tpu.memory_space<vmem>>, %arg10: memref<1x84xf32, #tpu.memory_space<vmem>>, %arg11: memref<1xf32, #tpu.memory_space<smem>>, %arg12: memref<84x42xbf16, #tpu.memory_space<vmem>>, %arg13: memref<84x42xbf16, #tpu.memory_space<vmem>>, %arg14: memref<1x42xf32, #tpu.memory_space<vmem>>, %arg15: memref<1x42xf32, #tpu.memory_space<vmem>>, %arg16: memref<1xf32, #tpu.memory_space<smem>>, %arg17: memref<256x42xf32, #tpu.memory_space<vmem>>) attributes {dimension_semantics = [], scalar_prefetch = 0 : i64, scratch_operands = 0 : i64, tpu.core_type = #tpu.core_type<tc>} {
    %c0 = arith.constant 0 : index
    %c0_0 = arith.constant 0 : index
    %0 = vector.load %arg0[%c0, %c0_0] : memref<32x66xbf16, #tpu.memory_space<vmem>>, vector<32x66xbf16>
    %c0_1 = arith.constant 0 : index
    %c0_2 = arith.constant 0 : index
    %1 = vector.load %arg1[%c0_1, %c0_2] : memref<66x336xbf16, #tpu.memory_space<vmem>>, vector<66x336xbf16>
    %cst = arith.constant dense<0.000000e+00> : vector<32x336xf32>
    %2 = tpu.matmul %0, %1, %cst {dimension_numbers = #tpu.dot_dimension_numbers<[1], [0], [0], [1], [0, 0, 1, 1], [], []>} : vector<32x66xbf16>, vector<66x336xbf16>, vector<32x336xf32> -> vector<32x336xf32>
    %3 = arith.truncf %2 : vector<32x336xf32> to vector<32x336xbf16>
    %c0_3 = arith.constant 0 : index
    %c0_4 = arith.constant 0 : index
    %4 = vector.load %arg2[%c0_3, %c0_4] : memref<336x168xbf16, #tpu.memory_space<vmem>>, vector<336x168xbf16>
    %cst_5 = arith.constant dense<0.000000e+00> : vector<32x168xf32>
    %5 = tpu.matmul %3, %4, %cst_5 {dimension_numbers = #tpu.dot_dimension_numbers<[1], [0], [0], [1], [0, 0, 1, 1], [], []>} : vector<32x336xbf16>, vector<336x168xbf16>, vector<32x168xf32> -> vector<32x168xf32>
    %c0_6 = arith.constant 0 : index
    %c0_7 = arith.constant 0 : index
    %6 = vector.load %arg3[%c0_6, %c0_7] : memref<336x168xbf16, #tpu.memory_space<vmem>>, vector<336x168xbf16>
    %cst_8 = arith.constant dense<0.000000e+00> : vector<32x168xf32>
    %7 = tpu.matmul %3, %6, %cst_8 {dimension_numbers = #tpu.dot_dimension_numbers<[1], [0], [0], [1], [0, 0, 1, 1], [], []>} : vector<32x336xbf16>, vector<336x168xbf16>, vector<32x168xf32> -> vector<32x168xf32>
    %8 = tpu.concatenate %5, %7 in 0 : vector<32x168xf32>, vector<32x168xf32> -> vector<64x168xf32>
    %cst_9 = arith.constant dense<0.000000e+00> : vector<168xf32>
    %9 = vector.multi_reduction <add>, %8, %cst_9 [0] : vector<64x168xf32> to vector<168xf32>
    %10 = vector.shape_cast %9 : vector<168xf32> to vector<1x168xf32>
    %cst_10 = arith.constant 1.562500e-02 : f32
    %11 = vector.broadcast %cst_10 : f32 to vector<1x168xf32>
    %12 = arith.mulf %10, %11 : vector<1x168xf32>
    %13 = vector.broadcast %12 : vector<1x168xf32> to vector<64x168xf32>
    %14 = arith.subf %8, %13 : vector<64x168xf32>
    %15 = arith.mulf %14, %14 : vector<64x168xf32>
    %cst_11 = arith.constant dense<0.000000e+00> : vector<168xf32>
    %16 = vector.multi_reduction <add>, %15, %cst_11 [0] : vector<64x168xf32> to vector<168xf32>
    %17 = vector.shape_cast %16 : vector<168xf32> to vector<1x168xf32>
    %cst_12 = arith.constant 1.562500e-02 : f32
    %18 = vector.broadcast %cst_12 : f32 to vector<1x168xf32>
    %19 = arith.mulf %17, %18 : vector<1x168xf32>
    %c0_13 = arith.constant 0 : index
    %c0_14 = arith.constant 0 : index
    %20 = vector.load %arg4[%c0_13, %c0_14] : memref<1x168xf32, #tpu.memory_space<vmem>>, vector<1x168xf32>
    %cst_15 = arith.constant 9.99999974E-6 : f32
    %21 = vector.broadcast %cst_15 : f32 to vector<1x168xf32>
    %22 = arith.addf %19, %21 : vector<1x168xf32>
    %23 = math.rsqrt %22 : vector<1x168xf32>
    %24 = arith.mulf %20, %23 : vector<1x168xf32>
    %25 = vector.broadcast %24 : vector<1x168xf32> to vector<64x168xf32>
    %26 = arith.mulf %14, %25 : vector<64x168xf32>
    %c0_16 = arith.constant 0 : index
    %c0_17 = arith.constant 0 : index
    %27 = vector.load %arg5[%c0_16, %c0_17] : memref<1x168xf32, #tpu.memory_space<vmem>>, vector<1x168xf32>
    %28 = vector.broadcast %27 : vector<1x168xf32> to vector<64x168xf32>
    %29 = arith.addf %26, %28 : vector<64x168xf32>
    %c0_18 = arith.constant 0 : index
    %30 = memref.load %arg6[%c0_18] : memref<1xf32, #tpu.memory_space<smem>>
    %cst_19 = arith.constant 0.000000e+00 : f32
    %31 = vector.broadcast %cst_19 : f32 to vector<64x168xf32>
    %32 = arith.cmpf oge, %29, %31 : vector<64x168xf32>
    %33 = vector.broadcast %30 : f32 to vector<64x168xf32>
    %34 = arith.mulf %33, %29 : vector<64x168xf32>
    %35 = arith.select %32, %29, %34 : vector<64x168xi1>, vector<64x168xf32>
    %36 = arith.truncf %35 : vector<64x168xf32> to vector<64x168xbf16>
    %c0_20 = arith.constant 0 : index
    %c0_21 = arith.constant 0 : index
    %37 = vector.load %arg7[%c0_20, %c0_21] : memref<168x84xbf16, #tpu.memory_space<vmem>>, vector<168x84xbf16>
    %cst_22 = arith.constant dense<0.000000e+00> : vector<64x84xf32>
    %38 = tpu.matmul %36, %37, %cst_22 {dimension_numbers = #tpu.dot_dimension_numbers<[1], [0], [0], [1], [0, 0, 1, 1], [], []>} : vector<64x168xbf16>, vector<168x84xbf16>, vector<64x84xf32> -> vector<64x84xf32>
    %c0_23 = arith.constant 0 : index
    %c0_24 = arith.constant 0 : index
    %39 = vector.load %arg8[%c0_23, %c0_24] : memref<168x84xbf16, #tpu.memory_space<vmem>>, vector<168x84xbf16>
    %cst_25 = arith.constant dense<0.000000e+00> : vector<64x84xf32>
    %40 = tpu.matmul %36, %39, %cst_25 {dimension_numbers = #tpu.dot_dimension_numbers<[1], [0], [0], [1], [0, 0, 1, 1], [], []>} : vector<64x168xbf16>, vector<168x84xbf16>, vector<64x84xf32> -> vector<64x84xf32>
    %41 = tpu.concatenate %38, %40 in 0 : vector<64x84xf32>, vector<64x84xf32> -> vector<128x84xf32>
    %cst_26 = arith.constant dense<0.000000e+00> : vector<84xf32>
    %42 = vector.multi_reduction <add>, %41, %cst_26 [0] : vector<128x84xf32> to vector<84xf32>
    %43 = vector.shape_cast %42 : vector<84xf32> to vector<1x84xf32>
    %cst_27 = arith.constant 7.812500e-03 : f32
    %44 = vector.broadcast %cst_27 : f32 to vector<1x84xf32>
    %45 = arith.mulf %43, %44 : vector<1x84xf32>
    %46 = vector.broadcast %45 : vector<1x84xf32> to vector<128x84xf32>
    %47 = arith.subf %41, %46 : vector<128x84xf32>
    %48 = arith.mulf %47, %47 : vector<128x84xf32>
    %cst_28 = arith.constant dense<0.000000e+00> : vector<84xf32>
    %49 = vector.multi_reduction <add>, %48, %cst_28 [0] : vector<128x84xf32> to vector<84xf32>
    %50 = vector.shape_cast %49 : vector<84xf32> to vector<1x84xf32>
    %cst_29 = arith.constant 7.812500e-03 : f32
    %51 = vector.broadcast %cst_29 : f32 to vector<1x84xf32>
    %52 = arith.mulf %50, %51 : vector<1x84xf32>
    %c0_30 = arith.constant 0 : index
    %c0_31 = arith.constant 0 : index
    %53 = vector.load %arg9[%c0_30, %c0_31] : memref<1x84xf32, #tpu.memory_space<vmem>>, vector<1x84xf32>
    %cst_32 = arith.constant 9.99999974E-6 : f32
    %54 = vector.broadcast %cst_32 : f32 to vector<1x84xf32>
    %55 = arith.addf %52, %54 : vector<1x84xf32>
    %56 = math.rsqrt %55 : vector<1x84xf32>
    %57 = arith.mulf %53, %56 : vector<1x84xf32>
    %58 = vector.broadcast %57 : vector<1x84xf32> to vector<128x84xf32>
    %59 = arith.mulf %47, %58 : vector<128x84xf32>
    %c0_33 = arith.constant 0 : index
    %c0_34 = arith.constant 0 : index
    %60 = vector.load %arg10[%c0_33, %c0_34] : memref<1x84xf32, #tpu.memory_space<vmem>>, vector<1x84xf32>
    %61 = vector.broadcast %60 : vector<1x84xf32> to vector<128x84xf32>
    %62 = arith.addf %59, %61 : vector<128x84xf32>
    %c0_35 = arith.constant 0 : index
    %63 = memref.load %arg11[%c0_35] : memref<1xf32, #tpu.memory_space<smem>>
    %cst_36 = arith.constant 0.000000e+00 : f32
    %64 = vector.broadcast %cst_36 : f32 to vector<128x84xf32>
    %65 = arith.cmpf oge, %62, %64 : vector<128x84xf32>
    %66 = vector.broadcast %63 : f32 to vector<128x84xf32>
    %67 = arith.mulf %66, %62 : vector<128x84xf32>
    %68 = arith.select %65, %62, %67 : vector<128x84xi1>, vector<128x84xf32>
    %69 = arith.truncf %68 : vector<128x84xf32> to vector<128x84xbf16>
    %c0_37 = arith.constant 0 : index
    %c0_38 = arith.constant 0 : index
    %70 = vector.load %arg12[%c0_37, %c0_38] : memref<84x42xbf16, #tpu.memory_space<vmem>>, vector<84x42xbf16>
    %cst_39 = arith.constant dense<0.000000e+00> : vector<128x42xf32>
    %71 = tpu.matmul %69, %70, %cst_39 {dimension_numbers = #tpu.dot_dimension_numbers<[1], [0], [0], [1], [0, 0, 1, 1], [], []>} : vector<128x84xbf16>, vector<84x42xbf16>, vector<128x42xf32> -> vector<128x42xf32>
    %c0_40 = arith.constant 0 : index
    %c0_41 = arith.constant 0 : index
    %72 = vector.load %arg13[%c0_40, %c0_41] : memref<84x42xbf16, #tpu.memory_space<vmem>>, vector<84x42xbf16>
    %cst_42 = arith.constant dense<0.000000e+00> : vector<128x42xf32>
    %73 = tpu.matmul %69, %72, %cst_42 {dimension_numbers = #tpu.dot_dimension_numbers<[1], [0], [0], [1], [0, 0, 1, 1], [], []>} : vector<128x84xbf16>, vector<84x42xbf16>, vector<128x42xf32> -> vector<128x42xf32>
    %74 = tpu.concatenate %71, %73 in 0 : vector<128x42xf32>, vector<128x42xf32> -> vector<256x42xf32>
    %cst_43 = arith.constant dense<0.000000e+00> : vector<42xf32>
    %75 = vector.multi_reduction <add>, %74, %cst_43 [0] : vector<256x42xf32> to vector<42xf32>
    %76 = vector.shape_cast %75 : vector<42xf32> to vector<1x42xf32>
    %cst_44 = arith.constant 3.906250e-03 : f32
    %77 = vector.broadcast %cst_44 : f32 to vector<1x42xf32>
    %78 = arith.mulf %76, %77 : vector<1x42xf32>
    %79 = vector.broadcast %78 : vector<1x42xf32> to vector<256x42xf32>
    %80 = arith.subf %74, %79 : vector<256x42xf32>
    %81 = arith.mulf %80, %80 : vector<256x42xf32>
    %cst_45 = arith.constant dense<0.000000e+00> : vector<42xf32>
    %82 = vector.multi_reduction <add>, %81, %cst_45 [0] : vector<256x42xf32> to vector<42xf32>
    %83 = vector.shape_cast %82 : vector<42xf32> to vector<1x42xf32>
    %cst_46 = arith.constant 3.906250e-03 : f32
    %84 = vector.broadcast %cst_46 : f32 to vector<1x42xf32>
    %85 = arith.mulf %83, %84 : vector<1x42xf32>
    %c0_47 = arith.constant 0 : index
    %c0_48 = arith.constant 0 : index
    %86 = vector.load %arg14[%c0_47, %c0_48] : memref<1x42xf32, #tpu.memory_space<vmem>>, vector<1x42xf32>
    %cst_49 = arith.constant 9.99999974E-6 : f32
    %87 = vector.broadcast %cst_49 : f32 to vector<1x42xf32>
    %88 = arith.addf %85, %87 : vector<1x42xf32>
    %89 = math.rsqrt %88 : vector<1x42xf32>
    %90 = arith.mulf %86, %89 : vector<1x42xf32>
    %91 = vector.broadcast %90 : vector<1x42xf32> to vector<256x42xf32>
    %92 = arith.mulf %80, %91 : vector<256x42xf32>
    %c0_50 = arith.constant 0 : index
    %c0_51 = arith.constant 0 : index
    %93 = vector.load %arg15[%c0_50, %c0_51] : memref<1x42xf32, #tpu.memory_space<vmem>>, vector<1x42xf32>
    %94 = vector.broadcast %93 : vector<1x42xf32> to vector<256x42xf32>
    %95 = arith.addf %92, %94 : vector<256x42xf32>
    %c0_52 = arith.constant 0 : index
    %96 = memref.load %arg16[%c0_52] : memref<1xf32, #tpu.memory_space<smem>>
    %cst_53 = arith.constant 0.000000e+00 : f32
    %97 = vector.broadcast %cst_53 : f32 to vector<256x42xf32>
    %98 = arith.cmpf oge, %95, %97 : vector<256x42xf32>
    %99 = vector.broadcast %96 : f32 to vector<256x42xf32>
    %100 = arith.mulf %99, %95 : vector<256x42xf32>
    %101 = arith.select %98, %95, %100 : vector<256x42xi1>, vector<256x42xf32>
    %c0_54 = arith.constant 0 : index
    %c0_55 = arith.constant 0 : index
    %102 = vector.load %arg17[%c0_54, %c0_55] : memref<256x42xf32, #tpu.memory_space<vmem>>, vector<256x42xf32>
    tpu.vector_store %arg17[%c0_54, %c0_55], %101 {strides = array<i32>} : memref<256x42xf32, #tpu.memory_space<vmem>>, vector<256x42xf32>,
    return
  }
}

</mosaic_0001>

<bundles_post_ra>
// kernel: tpu_custom_call.1
= control target key start
LH: loop header
LB: loop body
LE: loop exit
PB: predicated region body
PF: predicated region fallthrough
CT: control target
= control target key end

     0   :  { %v3005_v1 = vmov 0   ;;  %vm164_vm0 = vcmask 539648   ;;  %vm171_vm1 = vcmask 1040384   ;;  %vm541_vm2 = vcmask 654336   ;;  %s4719_s1 = inlined_call_operand.vmem [shape: bf16[66,336], index: 1, kind: input, shape index: {}]   ;;  %s4720_s0 = inlined_call_operand.vmem [shape: bf16[32,66], index: 0, kind: input, shape index: {}]   ;;  %s4721_s2 = inlined_call_operand.vmem [shape: bf16[336,168], index: 2, kind: input, shape index: {}]   ;;  %s4722_s3 = inlined_call_operand.vmem [shape: bf16[336,168], index: 3, kind: input, shape index: {}]   ;;  %s4723_s7 = inlined_call_operand.vmem [shape: bf16[168,84], index: 7, kind: input, shape index: {}]   ;;  %s4724_s8 = inlined_call_operand.vmem [shape: bf16[168,84], index: 8, kind: input, shape index: {}]   ;;  %s4725_s4 = inlined_call_operand.vmem [shape: f32[1,168], index: 4, kind: input, shape index: {}]   ;;  %s4726_s5 = inlined_call_operand.vmem [shape: f32[1,168], index: 5, kind: input, shape index: {}]   ;;  %s4727_s6 = inlined_call_operand.<no memory space> [shape: f32[1], index: 6, kind: input, shape index: {}]   ;;  %s4728_s12 = inlined_call_operand.vmem [shape: bf16[84,42], index: 12, kind: input, shape index: {}]   ;;  %s4729_s13 = inlined_call_operand.vmem [shape: bf16[84,42], index: 13, kind: input, shape index: {}]   ;;  %s4730_s9 = inlined_call_operand.vmem [shape: f32[1,84], index: 9, kind: input, shape index: {}]   ;;  %s4731_s10 = inlined_call_operand.vmem [shape: f32[1,84], index: 10, kind: input, shape index: {}]   ;;  %s4732_s11 = inlined_call_operand.<no memory space> [shape: f32[1], index: 11, kind: input, shape index: {}]   ;;  %s4733_s14 = inlined_call_operand.vmem [shape: f32[1,42], index: 14, kind: input, shape index: {}]   ;;  %s4734_s16 = inlined_call_operand.<no memory space> [shape: f32[1], index: 16, kind: input, shape index: {}]   ;;  %s4735_s15 = inlined_call_operand.vmem [shape: f32[1,42], index: 15, kind: input, shape index: {}]   ;;  %s4736_s17 = inlined_call_operand.vmem [shape: f32[256,42], index: 17, kind: output, shape index: {}]  }
   0x1   :  { %4750 = sst [smem:[#allocation10_spill]] %s4719_s1  ;;  %213 = vmatprep.mubr.bf16.mxu0 %v3005_v1  ;;  %v2839_v18 = vld [vmem:[%s4721_s2 + $0x4] ss:$8 sps:$4 sm:$0xff]   ;;  %v2837_v20 = vld [vmem:[%s4721_s2] ss:$8 sps:$4 sm:$0xff]   ;;  %vm1350_vm3 = vcmask 1043456  }
   0x2   :  { %4751 = sst [smem:[#allocation11_spill]] %s4720_s0  ;;  %s4752_s26 = sld [smem:[#allocation10_spill]]  ;;  %v2845_v21 = vld [vmem:[%s4721_s2 + $0x14] ss:$8 sps:$4 sm:$0xff]   ;;  %v2842_v23 = vld [vmem:[%s4722_s3 + $0x4] ss:$8 sps:$4 sm:$0xff]  }
   0x3   :  { %s4753_s29 = sld [smem:[#allocation11_spill]]  ;;  %v2843_v24 = vld [vmem:[%s4721_s2 + $0x10] ss:$8 sps:$4 sm:$0xff]   ;;  %v2851_v25 = vld [vmem:[%s4721_s2 + $0x24] ss:$8 sps:$4 sm:$0xff]   ;;  %vm1025_vm4 = vcmask 326656  }
   0x4   :  { %v2840_v26 = vld [vmem:[%s4722_s3] ss:$8 sps:$4 sm:$0xff]   ;;  %v2848_v28 = vld [vmem:[%s4722_s3 + $0x14] ss:$8 sps:$4 sm:$0xff]   ;;  %v2846_v31 = vld [vmem:[%s4722_s3 + $0x10] ss:$8 sps:$4 sm:$0xff]  }
   0x5   :  { %v2849_v29 = vld [vmem:[%s4721_s2 + $0x20] ss:$8 sps:$4 sm:$0xff]   ;;  %v2857_v30 = vld [vmem:[%s4721_s2 + $0x34] ss:$8 sps:$4 sm:$0xff]   ;;  %v2854_v32 = vld [vmem:[%s4722_s3 + $0x24] ss:$8 sps:$4 sm:$0xff]  }
   0x6   :  { %v2855_v33 = vld [vmem:[%s4721_s2 + $0x30] ss:$8 sps:$4 sm:$0xff]   ;;  %v2863_v34 = vld [vmem:[%s4721_s2 + $0x44] ss:$8 sps:$4 sm:$0xff]   ;;  %v2852_v35 = vld [vmem:[%s4722_s3 + $0x20] ss:$8 sps:$4 sm:$0xff]  }
   0x7   :  { %v2860_v36 = vld [vmem:[%s4722_s3 + $0x34] ss:$8 sps:$4 sm:$0xff]   ;;  %v2861_v37 = vld [vmem:[%s4721_s2 + $0x40] ss:$8 sps:$4 sm:$0xff]   ;;  %v2858_v39 = vld [vmem:[%s4722_s3 + $0x30] ss:$8 sps:$4 sm:$0xff]  }
   0x8   :  { %v2816_v0 = vld [vmem:[%s4752_s26 + $0x4] ss:$12 sps:$4 sm:$0xff]   ;;  %v2818_v2 = vld [vmem:[%s4752_s26] ss:$12 sps:$4 sm:$0xff]   ;;  %v2819_v3 = vld [vmem:[%s4752_s26 + $0x1c] ss:$12 sps:$4 sm:$0xff]  }
   0x9   :  { %181 = vmatprep.subr.bf16.mxu0 %v2816_v0  ;;  %v2821_v4 = vld [vmem:[%s4752_s26 + $0x18] ss:$12 sps:$4 sm:$0xff]   ;;  %v2822_v5 = vld [vmem:[%s4752_s26 + $0x34] ss:$12 sps:$4 sm:$0xff]   ;;  %v2824_v6 = vld [vmem:[%s4752_s26 + $0x30] ss:$12 sps:$4 sm:$0xff]  }
   0xa   :  { %182 = vmatpush1.bf16.msra.mxu0 %v2818_v2  ;;  %v2825_v7 = vld [vmem:[%s4752_s26 + $0x4c] ss:$12 sps:$4 sm:$0xff]   ;;  %v2830_v8 = vld [vmem:[%s4752_s26 + $0x8] ss:$12 sps:$4 sm:$0xff]   ;;  %v2831_v9 = vld [vmem:[%s4753_s29] sm:$0xff]  }
   0xb   :  { %183 = vmatprep.subr.bf16.mxu0 %v2819_v3  ;;  %v80_v10 = vld [vmem:[%s4752_s26 + $0x60] sm:$0x11]  ;;  %2725 = vmatprep.subr.bf16.mxu1 %v2830_v8  ;;  %v2827_v13 = vld [vmem:[%s4752_s26 + $0x48] ss:$12 sps:$4 sm:$0xff]   ;;  %v2835_v16 = vld [vmem:[%s4752_s26 + $0x50] ss:$12 sps:$4 sm:$0xff]  }
   0xc   :  { %v2832_v11 = vld [vmem:[%s4752_s26 + $0x20] ss:$12 sps:$4 sm:$0xff]   ;;  %2726 = vmatpush3.bf16.msra.mxu1 %v2830_v8  ;;  %v2833_v12 = vld [vmem:[%s4752_s26 + $0x38] ss:$12 sps:$4 sm:$0xff]   ;;  %2735 = vmatprep.mubr.msk.bf16.mxu1 %vm164_vm0, %v2831_v9  ;;  %v2535_v14 = vcombine.high %v80_v10, %v80_v10  ;;  %v2534_v15 = vcombine.low %v80_v10, %v80_v10  ;;  %v2869_v38 = vld [vmem:[%s4721_s2 + $0x54] ss:$8 sps:$4 sm:$0xff]  }
   0xd   :  { %2727 = vmatprep.subr.bf16.mxu1 %v2832_v11  ;;  %v2836_v19 = vld [vmem:[%s4752_s26 + $0x68] ss:$0 sps:$4 sm:$0x11]   ;;  %v2866_v40 = vld [vmem:[%s4722_s3 + $0x44] ss:$8 sps:$4 sm:$0xff]  }
   0xe   :  { %184 = vmatpush1.bf16.msra.mxu0 %v2821_v4  ;;  %v173_v17 = vsel %vm171_vm1, %v2534_v15, 0  ;;  %v179_v22 = vsel %vm171_vm1, %v2836_v19, 0  ;;  %v2834_v27 = vld [vmem:[%s4753_s29 + $0x8] sm:$0xff]   ;;  %v2867_v41 = vld [vmem:[%s4721_s2 + $0x50] ss:$8 sps:$4 sm:$0xff]  }
   0xf   :  { %185 = vmatprep.subr.bf16.mxu0 %v2822_v5  ;;  %v2875_v42 = vld [vmem:[%s4721_s2 + $0x64] ss:$8 sps:$4 sm:$0xff]   ;;  %v2864_v43 = vld [vmem:[%s4722_s3 + $0x40] ss:$8 sps:$4 sm:$0xff]   ;;  %v2872_v44 = vld [vmem:[%s4722_s3 + $0x54] ss:$8 sps:$4 sm:$0xff]  }
  0x10   :  { %2728 = vmatpush3.bf16.msra.mxu1 %v2832_v11  ;;  %v2873_v45 = vld [vmem:[%s4721_s2 + $0x60] ss:$8 sps:$4 sm:$0xff]   ;;  %v2881_v46 = vld [vmem:[%s4721_s2 + $0x74] ss:$8 sps:$4 sm:$0xff]   ;;  %v2870_v47 = vld [vmem:[%s4722_s3 + $0x50] ss:$8 sps:$4 sm:$0xff]  }
  0x11   :  { %2729 = vmatprep.subr.bf16.mxu1 %v2833_v12  ;;  %v2878_v48 = vld [vmem:[%s4722_s3 + $0x64] ss:$8 sps:$4 sm:$0xff]   ;;  %v2879_v49 = vld [vmem:[%s4721_s2 + $0x70] ss:$8 sps:$4 sm:$0xff]   ;;  %v2876_v51 = vld [vmem:[%s4722_s3 + $0x60] ss:$8 sps:$4 sm:$0xff]  }
  0x12   :  { %186 = vmatpush1.bf16.msra.mxu0 %v2824_v6  ;;  %v2887_v50 = vld [vmem:[%s4721_s2 + $0x84] ss:$8 sps:$4 sm:$0xff]   ;;  %v2884_v52 = vld [vmem:[%s4722_s3 + $0x74] ss:$8 sps:$4 sm:$0xff]   ;;  %v2882_v53 = vld [vmem:[%s4722_s3 + $0x70] ss:$8 sps:$4 sm:$0xff]  }
  0x13   :  { %187 = vmatprep.subr.bf16.mxu0 %v2825_v7  ;;  %v2885_v54 = vld [vmem:[%s4721_s2 + $0x80] ss:$8 sps:$4 sm:$0xff]   ;;  %v2890_v55 = vld [vmem:[%s4722_s3 + $0x84] ss:$8 sps:$4 sm:$0xff]   ;;  %v2893_v56 = vld [vmem:[%s4721_s2 + $0x94] ss:$8 sps:$4 sm:$0xff]  }
  0x14   :  { %2730 = vmatpush3.bf16.msra.mxu1 %v2833_v12  ;;  %v2891_v57 = vld [vmem:[%s4721_s2 + $0x90] ss:$8 sps:$4 sm:$0xff]   ;;  %v2899_v58 = vld [vmem:[%s4721_s2 + $0xa4] ss:$8 sps:$4 sm:$0xff]   ;;  %v2888_v59 = vld [vmem:[%s4722_s3 + $0x80] ss:$8 sps:$4 sm:$0xff]  }
  0x15   :  { %2731 = vmatprep.subr.bf16.mxu1 %v2835_v16  ;;  %v2896_v60 = vld [vmem:[%s4722_s3 + $0x94] ss:$8 sps:$4 sm:$0xff]   ;;  %v2897_v61 = vld [vmem:[%s4721_s2 + $0xa0] ss:$8 sps:$4 sm:$0xff]   ;;  %v2894_v63 = vld [vmem:[%s4722_s3 + $0x90] ss:$8 sps:$4 sm:$0xff]  }
  0x16   :  { %188 = vmatpush1.bf16.msra.mxu0 %v2827_v13  ;;  %v2905_v62 = vld [vmem:[%s4721_s2 + $0xb4] ss:$8 sps:$4 sm:$0xff]   ;;  %v2902_v0 = vld [vmem:[%s4722_s3 + $0xa4] ss:$8 sps:$4 sm:$0xff]   ;;  %v2903_v2 = vld [vmem:[%s4721_s2 + $0xb0] ss:$8 sps:$4 sm:$0xff]  }
  0x17   :  { %2537 = vmatprep.subr.msk.bf16.mxu0 %vm171_vm1, %v2535_v14  ;;  %v2911_v3 = vld [vmem:[%s4721_s2 + $0xc4] ss:$8 sps:$4 sm:$0xff]   ;;  %v2900_v4 = vld [vmem:[%s4722_s3 + $0xa0] ss:$8 sps:$4 sm:$0xff]   ;;  %v2908_v5 = vld [vmem:[%s4722_s3 + $0xb4] ss:$8 sps:$4 sm:$0xff]  }
  0x18   :  { %2732 = vmatpush3.bf16.msra.mxu1 %v2835_v16  ;;  %v2909_v6 = vld [vmem:[%s4721_s2 + $0xc0] ss:$8 sps:$4 sm:$0xff]   ;;  %v2917_v7 = vld [vmem:[%s4721_s2 + $0xd4] ss:$8 sps:$4 sm:$0xff]   ;;  %v2906_v8 = vld [vmem:[%s4722_s3 + $0xb0] ss:$8 sps:$4 sm:$0xff]  }
  0x19   :  { %2811 = vmatprep.subr.msk.bf16.mxu1 %vm171_vm1, %v2836_v19  ;;  %v2915_v10 = vld [vmem:[%s4721_s2 + $0xd0] ss:$8 sps:$4 sm:$0xff]   ;;  %v2923_v11 = vld [vmem:[%s4721_s2 + $0xe4] ss:$8 sps:$4 sm:$0xff]   ;;  %v2912_v12 = vld [vmem:[%s4722_s3 + $0xc0] ss:$8 sps:$4 sm:$0xff]  }
  0x1a   :  { %190 = vmatpush1.bf16.msra.mxu0 %v173_v17  ;;  %v2920_v13 = vld [vmem:[%s4722_s3 + $0xd4] ss:$8 sps:$4 sm:$0xff]   ;;  %v2921_v14 = vld [vmem:[%s4721_s2 + $0xe0] ss:$8 sps:$4 sm:$0xff]   ;;  %v2918_v15 = vld [vmem:[%s4722_s3 + $0xd0] ss:$8 sps:$4 sm:$0xff]  }
  0x1b   :  { %548 = vmatprep.subr.bf16.mxu0 %v2839_v18  ;;  %v2926_v16 = vld [vmem:[%s4722_s3 + $0xe4] ss:$8 sps:$4 sm:$0xff]   ;;  %v2924_v17 = vld [vmem:[%s4722_s3 + $0xe0] ss:$8 sps:$4 sm:$0xff]   ;;  %v2929_v18 = vld [vmem:[%s4721_s2 + $0xf4] ss:$8 sps:$4 sm:$0xff]  }
  0x1c   :  { %2734 = vmatpush3.bf16.msra.mxu1 %v179_v22  ;;  %v2932_v19 = vld [vmem:[%s4722_s3 + $0xf4] ss:$8 sps:$4 sm:$0xff]   ;;  %v2935_v22 = vld [vmem:[%s4721_s2 + $0x104] ss:$8 sps:$4 sm:$0xff]  }
  0x1d   :  { %2538 = vmatmul.mubr.msk.bf16.vlgmr.msra.gmra.mrb[0].mxu0 %vm164_vm0, %v2831_v9  ;;  %906 = vmatprep.subr.bf16.mxu1 %v2842_v23  ;;  %v2914_v9 = vld [vmem:[%s4722_s3 + $0xc4] ss:$8 sps:$4 sm:$0xff]  }
  0x1e   :  { %223 = vmatprep.mubr.bf16.mxu0 %v3005_v1  ;;  %549 = vmatpush1.bf16.msra.mxu0 %v2837_v20  ;;  %v2927_v20 = vld [vmem:[%s4721_s2 + $0xf0] ss:$8 sps:$4 sm:$0xff]   ;;  %v2938_v23 = vld [vmem:[%s4722_s3 + $0x104] ss:$8 sps:$4 sm:$0xff]  }
  0x1f   :  { %550 = vmatprep.subr.bf16.mxu0 %v2845_v21  ;;  %2736 = vmatmul.mubr.msk.bf16.vlgmr.msra.gmra.mrb[0].mxu1 %vm164_vm0, %v2834_v27  ;;  %v2930_v21 = vld [vmem:[%s4722_s3 + $0xf0] ss:$8 sps:$4 sm:$0xff]  }
  0x20   :  { %907 = vmatpush1.bf16.msra.mxu1 %v2840_v26 }
  0x21   :  { %908 = vmatprep.subr.bf16.mxu1 %v2848_v28 }
  0x22   :  { %551 = vmatpush1.bf16.msra.mxu0 %v2843_v24 }
  0x23   :  { %552 = vmatprep.subr.bf16.mxu0 %v2851_v25 }
  0x24   :  { %909 = vmatpush1.bf16.msra.mxu1 %v2846_v31  ;;  %v2936_v31 = vld [vmem:[%s4722_s3 + $0x100] ss:$8 sps:$4 sm:$0xff]  }
  0x25   :  { %2539 = vmatmul.mubr.msk.bf16.gmra.mrb[4].mxu0 %vm164_vm0, %v2834_v27  ;;  %910 = vmatprep.subr.bf16.mxu1 %v2854_v32  ;;  %v2941_v32 = vld [vmem:[%s4721_s2 + $0x114] ss:$8 sps:$4 sm:$0xff]  }
  0x26   :  { %553 = vmatpush1.bf16.msra.mxu0 %v2849_v29 }
  0x27   :  { %554 = vmatprep.subr.bf16.mxu0 %v2857_v30  ;;  %v2933_v30 = vld [vmem:[%s4721_s2 + $0x100] ss:$8 sps:$4 sm:$0xff]  }
  0x28   :  { %911 = vmatpush1.bf16.msra.mxu1 %v2852_v35 }
  0x29   :  { %912 = vmatprep.subr.bf16.mxu1 %v2860_v36 }
  0x2a   :  { %555 = vmatpush1.bf16.msra.mxu0 %v2855_v33  ;;  %v2944_v33 = vld [vmem:[%s4722_s3 + $0x114] ss:$8 sps:$4 sm:$0xff]  }
  0x2b   :  { %556 = vmatprep.subr.bf16.mxu0 %v2863_v34 }
  0x2c   :  { %913 = vmatpush1.bf16.msra.mxu1 %v2858_v39 }
  0x2d   :  { %914 = vmatprep.subr.bf16.mxu1 %v2866_v40 }
  0x2e   :  { %557 = vmatpush1.bf16.msra.mxu0 %v2861_v37  ;;  %v2939_v37 = vld [vmem:[%s4721_s2 + $0x110] ss:$8 sps:$4 sm:$0xff]  }
  0x2f   :  { %558 = vmatprep.subr.bf16.mxu0 %v2869_v38  ;;  %v2942_v38 = vld [vmem:[%s4722_s3 + $0x110] ss:$8 sps:$4 sm:$0xff]  }
  0x30   :  { %915 = vmatpush1.bf16.msra.mxu1 %v2864_v43 }
  0x31   :  { %916 = vmatprep.subr.bf16.mxu1 %v2872_v44 }
  0x32   :  { %559 = vmatpush1.bf16.msra.mxu0 %v2867_v41  ;;  %v2947_v41 = vld [vmem:[%s4721_s2 + $0x124] ss:$8 sps:$4 sm:$0xff]  }
  0x33   :  { %560 = vmatprep.subr.bf16.mxu0 %v2875_v42  ;;  %v2950_v42 = vld [vmem:[%s4722_s3 + $0x124] ss:$8 sps:$4 sm:$0xff]  }
  0x34   :  { %917 = vmatpush1.bf16.msra.mxu1 %v2870_v47 }
  0x35   :  { %918 = vmatprep.subr.bf16.mxu1 %v2878_v48 }
  0x36   :  { %561 = vmatpush1.bf16.msra.mxu0 %v2873_v45 }
  0x37   :  { %562 = vmatprep.subr.bf16.mxu0 %v2881_v46 }
  0x38   :  { %919 = vmatpush1.bf16.msra.mxu1 %v2876_v51  ;;  %v2948_v51 = vld [vmem:[%s4722_s3 + $0x120] ss:$8 sps:$4 sm:$0xff]  }
  0x39   :  { %920 = vmatprep.subr.bf16.mxu1 %v2884_v52  ;;  %v2953_v52 = vld [vmem:[%s4721_s2 + $0x134] ss:$8 sps:$4 sm:$0xff]  }
  0x3a   :  { %563 = vmatpush1.bf16.msra.mxu0 %v2879_v49 }
  0x3b   :  { %564 = vmatprep.subr.bf16.mxu0 %v2887_v50  ;;  %v2945_v50 = vld [vmem:[%s4721_s2 + $0x120] ss:$8 sps:$4 sm:$0xff]  }
  0x3c   :  { %921 = vmatpush1.bf16.msra.mxu1 %v2882_v53  ;;  %v2956_v53 = vld [vmem:[%s4722_s3 + $0x134] ss:$8 sps:$4 sm:$0xff]  }
  0x3d   :  { %922 = vmatprep.subr.bf16.mxu1 %v2890_v55  ;;  %v2954_v55 = vld [vmem:[%s4722_s3 + $0x130] ss:$8 sps:$4 sm:$0xff]  }
  0x3e   :  { %565 = vmatpush1.bf16.msra.mxu0 %v2885_v54  ;;  %v2951_v54 = vld [vmem:[%s4721_s2 + $0x130] ss:$8 sps:$4 sm:$0xff]  }
  0x3f   :  { %566 = vmatprep.subr.bf16.mxu0 %v2893_v56  ;;  %v2959_v56 = vld [vmem:[%s4721_s2 + $0x144] ss:$8 sps:$4 sm:$0xff]  }
  0x40   :  { %923 = vmatpush1.bf16.msra.mxu1 %v2888_v59  ;;  %v2960_v59 = vld [vmem:[%s4722_s3 + $0x140] ss:$8 sps:$4 sm:$0xff]  }
  0x41   :  { %924 = vmatprep.subr.bf16.mxu1 %v2896_v60  ;;  %v2963_v60 = vld [vmem:[%s4723_s7] sm:$0xff]  }
  0x42   :  { %567 = vmatpush1.bf16.msra.mxu0 %v2891_v57  ;;  %v2962_v57 = vld [vmem:[%s4722_s3 + $0x144] ss:$8 sps:$4 sm:$0xff]  }
  0x43   :  { %568 = vmatprep.subr.bf16.mxu0 %v2899_v58  ;;  %v2957_v58 = vld [vmem:[%s4721_s2 + $0x140] ss:$8 sps:$4 sm:$0xff]  }
  0x44   :  { %925 = vmatpush1.bf16.msra.mxu1 %v2894_v63  ;;  %v2966_v63 = vld [vmem:[%s4724_s8 + $0x8] sm:$0xff]  }
  0x45   :  { %926 = vmatprep.subr.bf16.mxu1 %v2902_v0  ;;  %v2967_v0 = vld [vmem:[%s4723_s7 + $0x10] sm:$0xff]  }
  0x46   :  { %569 = vmatpush1.bf16.msra.mxu0 %v2897_v61  ;;  %v2964_v61 = vld [vmem:[%s4724_s8] sm:$0xff]  }
  0x47   :  { %570 = vmatprep.subr.bf16.mxu0 %v2905_v62  ;;  %v2965_v62 = vld [vmem:[%s4723_s7 + $0x8] sm:$0xff]  }
  0x48   :  { %927 = vmatpush1.bf16.msra.mxu1 %v2900_v4  ;;  %v2970_v4 = vld [vmem:[%s4724_s8 + $0x18] sm:$0xff]  }
  0x49   :  { %928 = vmatprep.subr.bf16.mxu1 %v2908_v5  ;;  %v2971_v5 = vld [vmem:[%s4723_s7 + $0x20] sm:$0xff]  }
  0x4a   :  { %571 = vmatpush1.bf16.msra.mxu0 %v2903_v2  ;;  %v2968_v2 = vld [vmem:[%s4724_s8 + $0x10] sm:$0xff]  }
  0x4b   :  { %572 = vmatprep.subr.bf16.mxu0 %v2911_v3  ;;  %v2969_v3 = vld [vmem:[%s4723_s7 + $0x18] sm:$0xff]  }
  0x4c   :  { %929 = vmatpush1.bf16.msra.mxu1 %v2906_v8  ;;  %v2974_v8 = vld [vmem:[%s4724_s8 + $0x28] sm:$0xff]  }
  0x4d   :  { %930 = vmatprep.subr.bf16.mxu1 %v2914_v9  ;;  %v2975_v9 = vld [vmem:[%s4723_s7 + $0x30] sm:$0xff]  }
  0x4e   :  { %573 = vmatpush1.bf16.msra.mxu0 %v2909_v6  ;;  %v2972_v6 = vld [vmem:[%s4724_s8 + $0x20] sm:$0xff]  }
  0x4f   :  { %574 = vmatprep.subr.bf16.mxu0 %v2917_v7  ;;  %v2973_v7 = vld [vmem:[%s4723_s7 + $0x28] sm:$0xff]  }
  0x50   :  { %931 = vmatpush1.bf16.msra.mxu1 %v2912_v12  ;;  %v2978_v12 = vld [vmem:[%s4724_s8 + $0x38] sm:$0xff]  }
  0x51   :  { %932 = vmatprep.subr.bf16.mxu1 %v2920_v13  ;;  %v2979_v13 = vld [vmem:[%s4723_s7 + $0x40] sm:$0xff]  }
  0x52   :  { %575 = vmatpush1.bf16.msra.mxu0 %v2915_v10  ;;  %v2976_v10 = vld [vmem:[%s4724_s8 + $0x30] sm:$0xff]  }
  0x53   :  { %576 = vmatprep.subr.bf16.mxu0 %v2923_v11  ;;  %v2977_v11 = vld [vmem:[%s4723_s7 + $0x38] sm:$0xff]  }
  0x54   :  { %933 = vmatpush1.bf16.msra.mxu1 %v2918_v15  ;;  %v2981_v15 = vld [vmem:[%s4723_s7 + $0x48] sm:$0xff]  }
  0x55   :  { %934 = vmatprep.subr.bf16.mxu1 %v2926_v16  ;;  %v2982_v16 = vld [vmem:[%s4724_s8 + $0x48] sm:$0xff]  }
  0x56   :  { %577 = vmatpush1.bf16.msra.mxu0 %v2921_v14  ;;  %v2980_v14 = vld [vmem:[%s4724_s8 + $0x40] sm:$0xff]  }
  0x57   :  { %578 = vmatprep.subr.bf16.mxu0 %v2929_v18  ;;  %v2984_v18 = vld [vmem:[%s4724_s8 + $0x50] ss:$0 sps:$4 sm:$0xff]  }
  0x58   :  { %935 = vmatpush1.bf16.msra.mxu1 %v2924_v17  ;;  %v2983_v17 = vld [vmem:[%s4723_s7 + $0x50] ss:$0 sps:$4 sm:$0xff]  }
  0x59   :  { %936 = vmatprep.subr.bf16.mxu1 %v2932_v19  ;;  %v1352_v19 = vsel %vm1350_vm3, %v2983_v17, 0 }
  0x5a   :  { %579 = vmatpush1.bf16.msra.mxu0 %v2927_v20  ;;  %v1504_v20 = vsel %vm1350_vm3, %v2984_v18, 0 }
  0x5b   :  { %601 = vmatprep.subr.bf16.mxu0 %v2935_v22 }
  0x5c   :  { %937 = vmatpush1.bf16.msra.mxu1 %v2930_v21 }
  0x5d   :  { %959 = vmatprep.subr.bf16.mxu1 %v2938_v23 }
  0xf0   :  { %v215_v24 = vpop.f32.mrb[0].mxu0 }
  0xf1   :  { %v217_v25 = vpop.f32.mrb[1].mxu0 }
  0xf2   :  { %v219_v26 = vpop.f32.mrb[2].mxu0  ;;  %v2737_v34 = vpop.f32.mrb[0].mxu1 }
  0xf3   :  { %v283_v27 = vpack.c.bf16 %v219_v26, %v215_v24  ;;  %v221_v28 = vpop.f32.mrb[3].mxu0  ;;  %v268_v35 = vpop.f32.mrb[1].mxu1 }
  0xf4   :  { %v284_v29 = vpack.c.bf16 %v221_v28, %v217_v25  ;;  %v2738_v39 = vpop.f32.mrb[2].mxu1 }
  0xf5   :  { %v288_v43 = vpack.c.bf16 %v2738_v39, %v2737_v34  ;;  %v271_v44 = vpop.f32.mrb[3].mxu1 }
  0xf6   :  { %580 = vmatprep.mubr.bf16.mxu0 %v284_v29  ;;  %938 = vmatprep.mubr.bf16.mxu1 %v284_v29  ;;  %v285_v46 = vpack.c.bf16 %v271_v44, %v268_v35 }
  0xf7   :  { %581 = vmatmul.mubr.bf16.vlgmr.msra.gmra.mrb[8].mxu0 %v283_v27  ;;  %939 = vmatmul.mubr.bf16.vlgmr.msra.gmra.mrb[4].mxu1 %v283_v27 }
  0xf8   :  { %602 = vmatpush1.bf16.msra.mxu0 %v2933_v30  ;;  %960 = vmatpush1.bf16.msra.mxu1 %v2936_v31  ;;  %v225_v36 = vpop.f32.mrb[4].mxu0 }
  0xf9   :  { %v227_v40 = vpop.f32.mrb[5].mxu0  ;;  %603 = vmatprep.subr.bf16.mxu0 %v2941_v32  ;;  %961 = vmatprep.subr.bf16.mxu1 %v2944_v33 }
  0xfa   :  { %v229_v45 = vpop.f32.mrb[6].mxu0 }
  0xfb   :  { %v286_v47 = vpack.c.bf16 %v229_v45, %v225_v36  ;;  %v231_v48 = vpop.f32.mrb[7].mxu0 }
  0xfc   :  { %v287_v49 = vpack.c.bf16 %v231_v48, %v227_v40  ;;  %604 = vmatpush1.bf16.msra.mxu0 %v2939_v37  ;;  %962 = vmatpush1.bf16.msra.mxu1 %v2942_v38 }
  0xfd   :  { %605 = vmatprep.subr.bf16.mxu0 %v2947_v41  ;;  %963 = vmatprep.subr.bf16.mxu1 %v2950_v42 }
  0xfe   :  { %590 = vmatprep.mubr.bf16.mxu0 %v287_v49  ;;  %948 = vmatprep.mubr.bf16.mxu1 %v287_v49 }
  0xff   :  { %591 = vmatmul.mubr.bf16.gmra.mrb[12].mxu0 %v286_v47  ;;  %949 = vmatmul.mubr.bf16.gmra.mrb[8].mxu1 %v286_v47 }
 0x100   :  { %606 = vmatpush1.bf16.msra.mxu0 %v2945_v50  ;;  %964 = vmatpush1.bf16.msra.mxu1 %v2948_v51 }
 0x101   :  { %607 = vmatprep.subr.bf16.mxu0 %v2953_v52  ;;  %965 = vmatprep.subr.bf16.mxu1 %v2956_v53 }
 0x102   :  { %633 = vmatprep.mubr.bf16.mxu0 %v3005_v1  ;;  %991 = vmatprep.mubr.bf16.mxu1 %v3005_v1 }
 0x104   :  { %608 = vmatpush1.bf16.msra.mxu0 %v2951_v54  ;;  %966 = vmatpush1.bf16.msra.mxu1 %v2954_v55 }
 0x105   :  { %609 = vmatprep.subr.bf16.mxu0 %v2959_v56  ;;  %967 = vmatprep.subr.bf16.mxu1 %v2962_v57 }
 0x108   :  { %610 = vmatpush1.bf16.msra.mxu0 %v2957_v58  ;;  %968 = vmatpush1.bf16.msra.mxu1 %v2960_v59 }
 0x109   :  { %1354 = vmatprep.subr.bf16.mxu0 %v3005_v1  ;;  %1506 = vmatprep.subr.bf16.mxu1 %v3005_v1 }
 0x10b   :  { %2584 = vmatmul.mubr.msk.bf16.vlgmr.msra.gmra.mrb[8].mxu0 %vm541_vm2, %v285_v46  ;;  %2628 = vmatmul.mubr.msk.bf16.vlgmr.msra.gmra.mrb[4].mxu1 %vm541_vm2, %v285_v46 }
 0x10c   :  { %643 = vmatprep.mubr.bf16.mxu0 %v3005_v1  ;;  %1001 = vmatprep.mubr.bf16.mxu1 %v3005_v1 }
 0x10d   :  { %1355 = vmatpush1.bf16.msra.mxu0 %v2963_v60  ;;  %1507 = vmatpush1.bf16.msra.mxu1 %v2964_v61 }
 0x10e   :  { %1356 = vmatprep.subr.bf16.mxu0 %v3005_v1  ;;  %1508 = vmatprep.subr.bf16.mxu1 %v3005_v1 }
 0x111   :  { %1357 = vmatpush1.bf16.msra.mxu0 %v2965_v62  ;;  %1509 = vmatpush1.bf16.msra.mxu1 %v2966_v63 }
 0x112   :  { %1358 = vmatprep.subr.bf16.mxu0 %v3005_v1  ;;  %1510 = vmatprep.subr.bf16.mxu1 %v3005_v1 }
 0x113   :  { %2585 = vmatmul.mubr.msk.bf16.gmra.mrb[12].mxu0 %vm541_vm2, %v288_v43  ;;  %2629 = vmatmul.mubr.msk.bf16.gmra.mrb[8].mxu1 %vm541_vm2, %v288_v43 }
 0x115   :  { %1359 = vmatpush1.bf16.msra.mxu0 %v2967_v0  ;;  %1511 = vmatpush1.bf16.msra.mxu1 %v2968_v2 }
 0x116   :  { %1360 = vmatprep.subr.bf16.mxu0 %v3005_v1  ;;  %1512 = vmatprep.subr.bf16.mxu1 %v3005_v1 }
 0x119   :  { %1361 = vmatpush1.bf16.msra.mxu0 %v2969_v3  ;;  %1513 = vmatpush1.bf16.msra.mxu1 %v2970_v4 }
 0x11a   :  { %1362 = vmatprep.subr.bf16.mxu0 %v3005_v1  ;;  %1514 = vmatprep.subr.bf16.mxu1 %v3005_v1 }
 0x11d   :  { %1363 = vmatpush1.bf16.msra.mxu0 %v2971_v5  ;;  %1515 = vmatpush1.bf16.msra.mxu1 %v2972_v6 }
 0x11e   :  { %1364 = vmatprep.subr.bf16.mxu0 %v3005_v1  ;;  %1516 = vmatprep.subr.bf16.mxu1 %v3005_v1 }
 0x121   :  { %1365 = vmatpush1.bf16.msra.mxu0 %v2973_v7  ;;  %1517 = vmatpush1.bf16.msra.mxu1 %v2974_v8 }
 0x122   :  { %1366 = vmatprep.subr.bf16.mxu0 %v3005_v1  ;;  %1518 = vmatprep.subr.bf16.mxu1 %v3005_v1 }
 0x125   :  { %1367 = vmatpush1.bf16.msra.mxu0 %v2975_v9  ;;  %1519 = vmatpush1.bf16.msra.mxu1 %v2976_v10 }
 0x126   :  { %1368 = vmatprep.subr.bf16.mxu0 %v3005_v1  ;;  %1520 = vmatprep.subr.bf16.mxu1 %v3005_v1 }
 0x129   :  { %1369 = vmatpush1.bf16.msra.mxu0 %v2977_v11  ;;  %1521 = vmatpush1.bf16.msra.mxu1 %v2978_v12 }
 0x12a   :  { %1370 = vmatprep.subr.bf16.mxu0 %v3005_v1  ;;  %1522 = vmatprep.subr.bf16.mxu1 %v3005_v1 }
 0x12d   :  { %1371 = vmatpush1.bf16.msra.mxu0 %v2979_v13  ;;  %1523 = vmatpush1.bf16.msra.mxu1 %v2980_v14 }
 0x12e   :  { %1372 = vmatprep.subr.bf16.mxu0 %v3005_v1  ;;  %1524 = vmatprep.subr.bf16.mxu1 %v3005_v1 }
 0x131   :  { %1373 = vmatpush1.bf16.msra.mxu0 %v2981_v15  ;;  %1525 = vmatpush1.bf16.msra.mxu1 %v2982_v16 }
 0x132   :  { %1374 = vmatprep.subr.bf16.mxu0 %v3005_v1  ;;  %1526 = vmatprep.subr.bf16.mxu1 %v3005_v1 }
 0x135   :  { %1375 = vmatpush1.bf16.msra.mxu0 %v1352_v19  ;;  %1527 = vmatpush1.bf16.msra.mxu1 %v1504_v20 }
 0x1de   :  { %v635_v21 = vpop.f32.mrb[8].mxu0  ;;  %v993_v22 = vpop.f32.mrb[4].mxu1 }
 0x1df   :  { %v3499_v23 = vpop.f32.mrb[9].mxu0  ;;  %v3501_v24 = vpop.f32.mrb[5].mxu1 }
 0x1e0   :  { %v639_v25 = vpop.f32.mrb[10].mxu0  ;;  %v997_v26 = vpop.f32.mrb[6].mxu1  ;;  %v1026_v30 = vsel %vm1025_vm4, %v3499_v23, 0.0  ;;  %v1033_v47 = vsel %vm1025_vm4, %v3501_v24, 0.0 }
 0x1e1   :  { %v1012_v27 = vadd.f32 %v639_v25, %v635_v21  ;;  %v641_v28 = vpop.f32.mrb[11].mxu0  ;;  %v3503_v29 = vpop.f32.mrb[7].mxu1 }
 0x1e2   :  { %v1027_v1 = vsel %vm1025_vm4, %v641_v28, 0.0  ;;  %v1035_v50 = vsel %vm1025_vm4, %v3503_v29, 0.0 }
 0x1e3   :  { %v1028_v31 = vadd.f32 %v1027_v1, %v1026_v30 }
 0x1e6   :  { %v645_v32 = vpop.f32.mrb[12].mxu0  ;;  %v1003_v33 = vpop.f32.mrb[8].mxu1 }
 0x1e7   :  { %v1013_v34 = vadd.f32 %v1012_v27, %v645_v32  ;;  %v647_v35 = vpop.f32.mrb[13].mxu0  ;;  %v1005_v36 = vpop.f32.mrb[9].mxu1 }
 0x1e8   :  { %v1029_v37 = vsel %vm1025_vm4, %v647_v35, 0.0  ;;  %v649_v38 = vpop.f32.mrb[14].mxu0  ;;  %v1007_v39 = vpop.f32.mrb[10].mxu1  ;;  %v1037_v53 = vsel %vm1025_vm4, %v1005_v36, 0.0 }
 0x1e9   :  { %v1030_v40 = vadd.f32 %v1029_v37, %v1028_v31  ;;  %v1014_v41 = vadd.f32 %v1013_v34, %v649_v38  ;;  %v651_v42 = vpop.f32.mrb[15].mxu0  ;;  %v1009_v43 = vpop.f32.mrb[11].mxu1 }
 0x1ea   :  { %v1031_v44 = vsel %vm1025_vm4, %v651_v42, 0.0  ;;  %v1039_v56 = vsel %vm1025_vm4, %v1009_v43, 0.0 }
 0x1eb   :  { %v1015_v45 = vadd.f32 %v1014_v41, %v993_v22  ;;  %v1032_v46 = vadd.f32 %v1031_v44, %v1030_v40 }
 0x1ed   :  { %v1016_v48 = vadd.f32 %v1015_v45, %v997_v26  ;;  %v1034_v49 = vadd.f32 %v1033_v47, %v1032_v46 }
 0x1ef   :  { %v1017_v51 = vadd.f32 %v1016_v48, %v1003_v33  ;;  %v1036_v52 = vadd.f32 %v1035_v50, %v1034_v49 }
 0x1f1   :  { %v1018_v54 = vadd.f32 %v1017_v51, %v1007_v39  ;;  %v1038_v55 = vadd.f32 %v1037_v53, %v1036_v52 }
 0x1f3   :  { %v1019_v57 = vrot.slane %v1018_v54, 4  ;;  %v1040_v58 = vadd.f32 %v1039_v56, %v1038_v55 }
 0x1f5   :  { %v1020_v59 = vadd.f32 %v1019_v57, %v1018_v54  ;;  %v1041_v60 = vrot.slane %v1040_v58, 4 }
 0x1f7   :  { %v1021_v61 = vrot.slane %v1020_v59, 2  ;;  %v1042_v62 = vadd.f32 %v1041_v60, %v1040_v58 }
 0x1f9   :  { %v1022_v63 = vadd.f32 %v1021_v61, %v1020_v59  ;;  %v1043_v0 = vrot.slane %v1042_v62, 2 }
 0x1fb   :  { %v1023_v2 = vrot.slane %v1022_v63, 1  ;;  %v1044_v3 = vadd.f32 %v1043_v0, %v1042_v62 }
 0x1fd   :  { %v1024_v4 = vadd.f32 %v1023_v2, %v1022_v63  ;;  %v1045_v5 = vrot.slane %v1044_v3, 1 }
 0x1ff   :  { %v1047_v6 = vmul.f32 0.015625, %v1024_v4  ;;  %v1046_v7 = vadd.f32 %v1045_v5, %v1044_v3 }
 0x201   :  { %v3516_v8 = vsub.f32 %v635_v21, %v1047_v6  ;;  %v3518_v9 = vsub.f32 %v639_v25, %v1047_v6  ;;  %v3520_v10 = vsub.f32 %v645_v32, %v1047_v6  ;;  %v3522_v11 = vsub.f32 %v649_v38, %v1047_v6 }
 0x202   :  { %v3524_v12 = vsub.f32 %v993_v22, %v1047_v6  ;;  %v3526_v13 = vsub.f32 %v997_v26, %v1047_v6  ;;  %v3528_v14 = vsub.f32 %v1003_v33, %v1047_v6  ;;  %v3530_v15 = vsub.f32 %v1007_v39, %v1047_v6 }
 0x203   :  { %v1065_v16 = vmul.f32 %v3516_v8, %v3516_v8  ;;  %v1067_v17 = vmul.f32 %v3518_v9, %v3518_v9  ;;  %v1069_v18 = vmul.f32 %v3520_v10, %v3520_v10  ;;  %v1048_v20 = vmul.f32 0.015625, %v1046_v7 }
 0x204   :  { %v1071_v21 = vmul.f32 %v3522_v11, %v3522_v11  ;;  %v1073_v22 = vmul.f32 %v3524_v12, %v3524_v12  ;;  %v1077_v40 = vmul.f32 %v3528_v14, %v3528_v14  ;;  %v1079_v45 = vmul.f32 %v3530_v15, %v3530_v15 }
 0x205   :  { %v1081_v19 = vadd.f32 %v1067_v17, %v1065_v16  ;;  %v3543_v26 = vsub.f32 %v3499_v23, %v1048_v20  ;;  %v3545_v27 = vsub.f32 %v641_v28, %v1048_v20  ;;  %v3547_v30 = vsub.f32 %v647_v35, %v1048_v20 }
 0x206   :  { %v3549_v1 = vsub.f32 %v651_v42, %v1048_v20  ;;  %v3552_v31 = vsub.f32 %v3501_v24, %v1048_v20  ;;  %v3555_v32 = vsub.f32 %v3503_v29, %v1048_v20  ;;  %v3557_v33 = vsub.f32 %v1005_v36, %v1048_v20 }
 0x207   :  { %v1082_v25 = vadd.f32 %v1081_v19, %v1069_v18  ;;  %v3559_v37 = vsub.f32 %v1009_v43, %v1048_v20  ;;  %v1066_v23 = vmul.f32 %v3543_v26, %v3543_v26  ;;  %v1068_v28 = vmul.f32 %v3545_v27, %v3545_v27 }
 0x208   :  { %v1070_v35 = vmul.f32 %v3547_v30, %v3547_v30  ;;  %v1075_v24 = vmul.f32 %v3526_v13, %v3526_v13  ;;  %v1072_v36 = vmul.f32 %v3549_v1, %v3549_v1  ;;  %v1074_v43 = vmul.f32 %v3552_v31, %v3552_v31 }
 0x209   :  { %v1083_v34 = vadd.f32 %v1082_v25, %v1071_v21  ;;  %v1094_v29 = vsel %vm1025_vm4, %v1066_v23, 0.0  ;;  %v1095_v39 = vsel %vm1025_vm4, %v1068_v28, 0.0  ;;  %v1076_v48 = vmul.f32 %v3555_v32, %v3555_v32 }
 0x20a   :  { %v1096_v42 = vadd.f32 %v1095_v39, %v1094_v29  ;;  %v1097_v44 = vsel %vm1025_vm4, %v1070_v35, 0.0  ;;  %v1099_v49 = vsel %vm1025_vm4, %v1072_v36, 0.0  ;;  %v1078_v52 = vmul.f32 %v3557_v33, %v3557_v33 }
 0x20b   :  { %v1084_v38 = vadd.f32 %v1083_v34, %v1073_v22  ;;  %v1101_v53 = vsel %vm1025_vm4, %v1074_v43, 0.0  ;;  %v1080_v56 = vmul.f32 %v3559_v37, %v3559_v37  ;;  %v1103_v57 = vsel %vm1025_vm4, %v1076_v48, 0.0 }
 0x20c   :  { %v1098_v47 = vadd.f32 %v1097_v44, %v1096_v42  ;;  %v1105_v60 = vsel %vm1025_vm4, %v1078_v52, 0.0  ;;  %v3006_v25 = vmov 1966171168   ;;  %v1128_v23 = vlaneseq  ;;  %v1168_v44 = vld [vmem:[%s4726_s5] sm:$0x3] }
 0x20d   :  { %v1085_v41 = vadd.f32 %v1084_v38, %v1075_v24  ;;  %v1107_v63 = vsel %vm1025_vm4, %v1080_v56, 0.0  ;;  %v1126_v34 = vunpack.c.l.s4 %v3006_v25 }
 0x20e   :  { %v1100_v51 = vadd.f32 %v1099_v49, %v1098_v47  ;;  %v1129_v35 = vshrl.u32 %v1128_v23, 7 }
 0x20f   :  { %v1086_v46 = vadd.f32 %v1085_v41, %v1077_v40  ;;  %v1127_v28 = vunpack.c.0.s8 %v1126_v34  ;;  %v1117_v40 = vld [vmem:[%s4725_s4] sm:$0x3] }
 0x210   :  { %v1102_v55 = vadd.f32 %v1101_v53, %v1100_v51  ;;  %v3594_v42 = vsub.s32 0, %v1129_v35  ;;  %v1148_v43 = vsub.s32 1, %v1129_v35 }
 0x211   :  { %v1087_v50 = vadd.f32 %v1086_v46, %v1079_v45  ;;  %v1130_v38 = vsub.s32 %v1127_v28, %v1129_v35 }
 0x212   :  { %v1104_v59 = vadd.f32 %v1103_v57, %v1102_v55  ;;  %v3605_v48 = vrot.slane %v1168_v44, %v3594_v42  ;;  %v3607_v49 = vrot.slane %v1168_v44, %v1148_v43 }
 0x213   :  { %v1088_v54 = vrot.slane %v1087_v50, 4 }
 0x214   :  { %v1106_v62 = vadd.f32 %v1105_v60, %v1104_v59 }
 0x215   :  { %v1089_v58 = vadd.f32 %v1088_v54, %v1087_v50  ;;  %v3612_v50 = vstv %s4727_s6 }
 0x216   :  { %v1108_v2 = vadd.f32 %v1107_v63, %v1106_v62 }
 0x217   :  { %v1090_v61 = vrot.slane %v1089_v58, 2 }
 0x218   :  { %v1109_v4 = vrot.slane %v1108_v2, 4 }
 0x219   :  { %v1091_v0 = vadd.f32 %v1090_v61, %v1089_v58 }
 0x21a   :  { %v1110_v5 = vadd.f32 %v1109_v4, %v1108_v2 }
 0x21b   :  { %v1092_v3 = vrot.slane %v1091_v0, 1 }
 0x21c   :  { %v1111_v7 = vrot.slane %v1110_v5, 2 }
 0x21d   :  { %v1093_v6 = vadd.f32 %v1092_v3, %v1091_v0 }
 0x21e   :  { %v1112_v16 = vadd.f32 %v1111_v7, %v1110_v5 }
 0x21f   :  { %v1115_v17 = vmul.f32 0.015625, %v1093_v6 }
 0x220   :  { %v1113_v18 = vrot.slane %v1112_v16, 1 }
 0x221   :  { %v1118_v20 = vadd.f32 1e-05, %v1115_v17 }
 0x222   :  { %v1114_v19 = vadd.f32 %v1113_v18, %v1112_v16 }
 0x223   :  { %2997 = vrsqrt.f32 %v1118_v20 }
 0x224   :  { %v1116_v21 = vmul.f32 0.015625, %v1114_v19 }
 0x226   :  { %v1119_v22 = vadd.f32 1e-05, %v1116_v21 }
 0x228   :  { %2999 = vrsqrt.f32 %v1119_v22 }
 0x22d   :  { %v2998_v24 = vpop.eup %2997 }
 0x232   :  { %v3000_v29 = vpop.eup %2999 }
 0x233   :  { %v1124_v36 = vcombine.low %v2998_v24, %v3000_v29 }
 0x235   :  { %v1131_v39 = vrot.slane %v1124_v36, %v1130_v38 }
 0x237   :  { %v1138_v41 = vrot.slane %v1131_v39, %v1130_v38 }
 0x239   :  { %v1140_v45 = vmul.f32 %v1138_v41, %v1117_v40 }
 0x23b   :  { %v3600_v46 = vrot.slane %v1140_v45, %v3594_v42  ;;  %v3602_v47 = vrot.slane %v1140_v45, %v1148_v43 }
 0x23d   :  { %v1167_v51 = vmul.f32 %v3602_v47, %v3559_v37  ;;  %v1153_v52 = vmul.f32 %v3602_v47, %v3543_v26  ;;  %v1155_v53 = vmul.f32 %v3602_v47, %v3545_v27  ;;  %v1152_v54 = vmul.f32 %v3600_v46, %v3516_v8 }
 0x23e   :  { %v1154_v55 = vmul.f32 %v3600_v46, %v3518_v9  ;;  %v1157_v56 = vmul.f32 %v3602_v47, %v3547_v30  ;;  %v1159_v57 = vmul.f32 %v3602_v47, %v3549_v1  ;;  %v1156_v37 = vmul.f32 %v3600_v46, %v3520_v10 }
 0x23f   :  { %v3631_v26 = vadd.f32 %v3607_v49, %v1167_v51  ;;  %v1181_v27 = vadd.f32 %v3607_v49, %v1153_v52  ;;  %v1183_v58 = vadd.f32 %v3607_v49, %v1155_v53  ;;  %v1180_v8 = vadd.f32 %v3605_v48, %v1152_v54 }
 0x240   :  { %v1182_v9 = vadd.f32 %v3605_v48, %v1154_v55  ;;  %v1185_v59 = vadd.f32 %v3607_v49, %v1157_v56  ;;  %v1187_v30 = vadd.f32 %v3607_v49, %v1159_v57  ;;  %v1158_v1 = vmul.f32 %v3600_v46, %v3522_v11 }
 0x241   :  { %v1229_v10 = vmul.f32 %v3612_v50, %v3631_v26  ;;  %vm1198_vm5 = vcmp.ge.f32.partialorder %v1181_v27, 0.0  ;;  %vm1200_vm6 = vcmp.ge.f32.partialorder %v1183_v58, 0.0  ;;  %v1215_v60 = vmul.f32 %v3612_v50, %v1181_v27 }
 0x242   :  { %v1217_v61 = vmul.f32 %v3612_v50, %v1183_v58  ;;  %vm1197_vm7 = vcmp.ge.f32.partialorder %v1180_v8, 0.0  ;;  %vm1199_vm8 = vcmp.ge.f32.partialorder %v1182_v9, 0.0  ;;  %v1214_v62 = vmul.f32 %v3612_v50, %v1180_v8 }
 0x243   :  { %v1216_v63 = vmul.f32 %v3612_v50, %v1182_v9  ;;  %vm1202_vm9 = vcmp.ge.f32.partialorder %v1185_v59, 0.0  ;;  %vm1204_vm10 = vcmp.ge.f32.partialorder %v1187_v30, 0.0  ;;  %v1231_v0 = vsel %vm1198_vm5, %v1181_v27, %v1215_v60 }
 0x244   :  { %v1233_v2 = vsel %vm1200_vm6, %v1183_v58, %v1217_v61  ;;  %v1219_v11 = vmul.f32 %v3612_v50, %v1185_v59  ;;  %v1221_v3 = vmul.f32 %v3612_v50, %v1187_v30  ;;  %v1230_v5 = vsel %vm1197_vm7, %v1180_v8, %v1214_v62 }
 0x245   :  { %v1247_v4 = vpack.c.bf16 %v1233_v2, %v1231_v0  ;;  %v1232_v6 = vsel %vm1199_vm8, %v1182_v9, %v1216_v63  ;;  %v1184_v7 = vadd.f32 %v3605_v48, %v1156_v37  ;;  %v1186_v19 = vadd.f32 %v3605_v48, %v1158_v1  ;;  %v2986_v2 = vld [vmem:[%s4728_s12 + $0x8] sm:$0xff]  }
 0x246   :  { %v1246_v16 = vpack.c.bf16 %v1232_v6, %v1230_v5  ;;  %v1235_v17 = vsel %vm1202_vm9, %v1185_v59, %v1219_v11  ;;  %v1237_v18 = vsel %vm1204_vm10, %v1187_v30, %v1221_v3  ;;  %v1161_v22 = vmul.f32 %v3602_v47, %v3552_v31  ;;  %v2985_v59 = vld [vmem:[%s4728_s12] sm:$0xff]   ;;  %v2988_v11 = vld [vmem:[%s4728_s12 + $0x10] sm:$0xff]   ;;  %v2989_v3 = vld [vmem:[%s4729_s13 + $0x8] sm:$0xff]  }
 0x247   :  { %2641 = vmatprep.mubr.msk.bf16.mxu0 %vm1025_vm4, %v1247_v4  ;;  %2656 = vmatprep.mubr.msk.bf16.mxu1 %vm1025_vm4, %v1247_v4  ;;  %v1249_v20 = vpack.c.bf16 %v1237_v18, %v1235_v17  ;;  %vm1201_vm11 = vcmp.ge.f32.partialorder %v1184_v7, 0.0  ;;  %v1218_v21 = vmul.f32 %v3612_v50, %v1184_v7  ;;  %vm1203_vm12 = vcmp.ge.f32.partialorder %v1186_v19, 0.0  ;;  %v2987_v30 = vld [vmem:[%s4729_s13] sm:$0xff]   ;;  %v2990_v17 = vld [vmem:[%s4728_s12 + $0x18] sm:$0xff]   ;;  %v2991_v18 = vld [vmem:[%s4729_s13 + $0x10] sm:$0xff]  }
 0x248   :  { %1387 = vmatmul.mubr.bf16.vlgmr.msra.gmra.mrb[16].mxu0 %v1246_v16  ;;  %1539 = vmatmul.mubr.bf16.vlgmr.msra.gmra.mrb[12].mxu1 %v1246_v16  ;;  %v1220_v25 = vmul.f32 %v3612_v50, %v1186_v19  ;;  %v1163_v34 = vmul.f32 %v3602_v47, %v3555_v32  ;;  %v1160_v23 = vmul.f32 %v3600_v46, %v3524_v12  ;;  %vm1212_vm13 = vcmp.ge.f32.partialorder %v3631_v26, 0.0 }
 0x249   :  { %2642 = vmatprep.mubr.msk.bf16.mxu0 %vm1025_vm4, %v1249_v20  ;;  %2657 = vmatprep.mubr.msk.bf16.mxu1 %vm1025_vm4, %v1249_v20  ;;  %v1234_v28 = vsel %vm1201_vm11, %v1184_v7, %v1218_v21  ;;  %v1189_v31 = vadd.f32 %v3607_v49, %v1161_v22  ;;  %v1162_v35 = vmul.f32 %v3600_v46, %v3526_v13  ;;  %vm1571_vm6 = vcmask 687104  }
 0x24a   :  { %v1236_v24 = vsel %vm1203_vm12, %v1186_v19, %v1220_v25  ;;  %v1191_v38 = vadd.f32 %v3607_v49, %v1163_v34  ;;  %v1188_v32 = vadd.f32 %v3605_v48, %v1160_v23  ;;  %v1165_v12 = vmul.f32 %v3602_v47, %v3557_v33  ;;  %2739 = vmatprep.subr.bf16.mxu0 %v2985_v59  ;;  %v2992_v19 = vld [vmem:[%s4729_s13 + $0x18] sm:$0xff]  }
 0x24b   :  { %v1248_v29 = vpack.c.bf16 %v1236_v24, %v1234_v28  ;;  %vm1206_vm14 = vcmp.ge.f32.partialorder %v1189_v31, 0.0  ;;  %v1223_v36 = vmul.f32 %v3612_v50, %v1189_v31  ;;  %v1190_v39 = vadd.f32 %v3605_v48, %v1162_v35  ;;  %2767 = vmatprep.subr.bf16.mxu1 %v2987_v30  ;;  %2740 = vmatpush3.bf16.msra.mxu0 %v2985_v59  ;;  %v2994_v35 = vld [vmem:[%s4729_s13 + $0x20] sm:$0xff]  }
 0x24c   :  { %vm1208_vm15 = vcmp.ge.f32.partialorder %v1191_v38, 0.0  ;;  %v1225_v40 = vmul.f32 %v3612_v50, %v1191_v38  ;;  %vm1205_vm0 = vcmp.ge.f32.partialorder %v1188_v32, 0.0  ;;  %v1222_v13 = vmul.f32 %v3612_v50, %v1188_v32  ;;  %2768 = vmatpush3.bf16.msra.mxu1 %v2987_v30  ;;  %2741 = vmatprep.subr.bf16.mxu0 %v2986_v2 }
 0x24d   :  { %v1239_v41 = vsel %vm1206_vm14, %v1189_v31, %v1223_v36  ;;  %vm1207_vm1 = vcmp.ge.f32.partialorder %v1190_v39, 0.0  ;;  %v1224_v43 = vmul.f32 %v3612_v50, %v1190_v39  ;;  %v1193_v44 = vadd.f32 %v3607_v49, %v1165_v12  ;;  %2769 = vmatprep.subr.bf16.mxu1 %v2989_v3  ;;  %v2993_v31 = vld [vmem:[%s4728_s12 + $0x20] sm:$0xff]   ;;  %v2995_v36 = vld [vmem:[%s4728_s12 + $0x28] ss:$0 sps:$4 sm:$0x33]  }
 0x24e   :  { %v1241_v45 = vsel %vm1208_vm15, %v1191_v38, %v1225_v40  ;;  %v1238_v33 = vsel %vm1205_vm0, %v1188_v32, %v1222_v13  ;;  %v1245_v47 = vsel %vm1212_vm13, %v3631_v26, %v1229_v10  ;;  %v1164_v51 = vmul.f32 %v3600_v46, %v3528_v14 }
 0x24f   :  { %v1251_v52 = vpack.c.bf16 %v1241_v45, %v1239_v41  ;;  %v1240_v53 = vsel %vm1207_vm1, %v1190_v39, %v1224_v43  ;;  %vm1210_vm2 = vcmp.ge.f32.partialorder %v1193_v44, 0.0  ;;  %v1227_v54 = vmul.f32 %v3612_v50, %v1193_v44  ;;  %2742 = vmatpush3.bf16.msra.mxu0 %v2986_v2  ;;  %v2996_v41 = vld [vmem:[%s4729_s13 + $0x28] ss:$0 sps:$4 sm:$0x33]  }
 0x250   :  { %1395 = vmatmul.mubr.bf16.gmra.mrb[20].mxu0 %v1248_v29  ;;  %1547 = vmatmul.mubr.bf16.gmra.mrb[16].mxu1 %v1248_v29  ;;  %v1250_v55 = vpack.c.bf16 %v1240_v53, %v1238_v33  ;;  %v1166_v49 = vmul.f32 %v3600_v46, %v3530_v15  ;;  %v1192_v37 = vadd.f32 %v3605_v48, %v1164_v51 }
 0x251   :  { %2643 = vmatprep.mubr.msk.bf16.mxu0 %vm1025_vm4, %v1251_v52  ;;  %2658 = vmatprep.mubr.msk.bf16.mxu1 %vm1025_vm4, %v1251_v52  ;;  %v1243_v56 = vsel %vm1210_vm2, %v1193_v44, %v1227_v54 }
 0x252   :  { %v1253_v57 = vpack.c.bf16 %v1245_v47, %v1243_v56  ;;  %v1194_v14 = vadd.f32 %v3605_v48, %v1166_v49  ;;  %v1226_v26 = vmul.f32 %v3612_v50, %v1192_v37  ;;  %vm1209_vm3 = vcmp.ge.f32.partialorder %v1192_v37, 0.0  ;;  %2743 = vmatprep.subr.bf16.mxu0 %v2988_v11  ;;  %2770 = vmatpush3.bf16.msra.mxu1 %v2989_v3 }
 0x253   :  { %2771 = vmatprep.subr.bf16.mxu1 %v2991_v18  ;;  %2744 = vmatpush3.bf16.msra.mxu0 %v2988_v11 }
 0x254   :  { %v1228_v27 = vmul.f32 %v3612_v50, %v1194_v14  ;;  %vm1211_vm5 = vcmp.ge.f32.partialorder %v1194_v14, 0.0  ;;  %v1242_v15 = vsel %vm1209_vm3, %v1192_v37, %v1226_v26  ;;  %2745 = vmatprep.subr.bf16.mxu0 %v2990_v17 }
 0x256   :  { %v1244_v46 = vsel %vm1211_vm5, %v1194_v14, %v1228_v27  ;;  %2772 = vmatpush3.bf16.msra.mxu1 %v2991_v18 }
 0x257   :  { %v1252_v58 = vpack.c.bf16 %v1244_v46, %v1242_v15  ;;  %2773 = vmatprep.subr.bf16.mxu1 %v2992_v19  ;;  %2746 = vmatpush3.bf16.msra.mxu0 %v2990_v17 }
 0x258   :  { %1403 = vmatmul.mubr.bf16.gmra.mrb[24].mxu0 %v1250_v55  ;;  %1555 = vmatmul.mubr.bf16.gmra.mrb[20].mxu1 %v1250_v55 }
 0x259   :  { %2644 = vmatprep.mubr.msk.bf16.mxu0 %vm1025_vm4, %v1253_v57  ;;  %2659 = vmatprep.mubr.msk.bf16.mxu1 %vm1025_vm4, %v1253_v57  ;;  %vm1855_vm4 = vcmask 1041408  }
 0x25a   :  { %2747 = vmatprep.subr.bf16.mxu0 %v2993_v31  ;;  %2774 = vmatpush3.bf16.msra.mxu1 %v2992_v19  ;;  %v1857_v47 = vsel %vm1855_vm4, %v2995_v36, 0  ;;  %v2001_v51 = vsel %vm1855_vm4, %v2996_v41, 0 }
 0x25b   :  { %2775 = vmatprep.subr.bf16.mxu1 %v2994_v35  ;;  %2748 = vmatpush3.bf16.msra.mxu0 %v2993_v31 }
 0x25c   :  { %2812 = vmatprep.subr.msk.bf16.mxu0 %vm1855_vm4, %v2995_v36 }
 0x25e   :  { %2776 = vmatpush3.bf16.msra.mxu1 %v2994_v35 }
 0x25f   :  { %2813 = vmatprep.subr.msk.bf16.mxu1 %vm1855_vm4, %v2996_v41  ;;  %2750 = vmatpush3.bf16.msra.mxu0 %v1857_v47 }
 0x260   :  { %1411 = vmatmul.mubr.bf16.gmra.mrb[28].mxu0 %v1252_v58  ;;  %1563 = vmatmul.mubr.bf16.gmra.mrb[24].mxu1 %v1252_v58 }
 0x262   :  { %2778 = vmatpush3.bf16.msra.mxu1 %v2001_v51 }
 0x31b   :  { %v3693_v8 = vpop.f32.mrb[16].mxu0  ;;  %v3695_v48 = vpop.f32.mrb[12].mxu1 }
 0x31c   :  { %v1390_v9 = vpop.f32.mrb[17].mxu0  ;;  %v1542_v50 = vpop.f32.mrb[13].mxu1  ;;  %v1572_v60 = vsel %vm1571_vm6, %v3693_v8, 0.0  ;;  %v1587_v46 = vsel %vm1571_vm6, %v3695_v48, 0.0 }
 0x31d   :  { %v3703_v1 = vpop.f32.mrb[18].mxu0  ;;  %v3705_v10 = vpop.f32.mrb[14].mxu1 }
 0x31e   :  { %v1573_v61 = vsel %vm1571_vm6, %v3703_v1, 0.0  ;;  %v1393_v62 = vpop.f32.mrb[19].mxu0  ;;  %v1545_v63 = vpop.f32.mrb[15].mxu1  ;;  %v1589_v9 = vsel %vm1571_vm6, %v3705_v10, 0.0 }
 0x31f   :  { %v1574_v0 = vadd.f32 %v1573_v61, %v1572_v60 }
 0x323   :  { %v3720_v4 = vpop.f32.mrb[20].mxu0  ;;  %v3722_v5 = vpop.f32.mrb[16].mxu1 }
 0x324   :  { %v1575_v6 = vsel %vm1571_vm6, %v3720_v4, 0.0  ;;  %v1398_v7 = vpop.f32.mrb[21].mxu0  ;;  %v1550_v16 = vpop.f32.mrb[17].mxu1  ;;  %v1591_v59 = vsel %vm1571_vm6, %v3722_v5, 0.0 }
 0x325   :  { %v1576_v20 = vadd.f32 %v1575_v6, %v1574_v0  ;;  %v3735_v21 = vpop.f32.mrb[22].mxu0  ;;  %v3737_v22 = vpop.f32.mrb[18].mxu1 }
 0x326   :  { %v1577_v25 = vsel %vm1571_vm6, %v3735_v21, 0.0  ;;  %v1401_v34 = vpop.f32.mrb[23].mxu0  ;;  %v1553_v23 = vpop.f32.mrb[19].mxu1  ;;  %v1593_v60 = vsel %vm1571_vm6, %v3737_v22, 0.0 }
 0x327   :  { %v1578_v28 = vadd.f32 %v1577_v25, %v1576_v20 }
 0x32b   :  { %v3747_v24 = vpop.f32.mrb[24].mxu0  ;;  %v3749_v38 = vpop.f32.mrb[20].mxu1 }
 0x32c   :  { %v1579_v32 = vsel %vm1571_vm6, %v3747_v24, 0.0  ;;  %v1406_v12 = vpop.f32.mrb[25].mxu0  ;;  %v1558_v29 = vpop.f32.mrb[21].mxu1  ;;  %v1595_v62 = vsel %vm1571_vm6, %v3749_v38, 0.0 }
 0x32d   :  { %v1580_v39 = vadd.f32 %v1579_v32, %v1578_v28  ;;  %v1407_v40 = vpop.f32.mrb[26].mxu0  ;;  %v3756_v13 = vpop.f32.mrb[22].mxu1 }
 0x32e   :  { %v1581_v43 = vsel %vm1571_vm6, %v1407_v40, 0.0  ;;  %v1409_v44 = vpop.f32.mrb[27].mxu0  ;;  %v1561_v45 = vpop.f32.mrb[23].mxu1  ;;  %v1597_v0 = vsel %vm1571_vm6, %v3756_v13, 0.0 }
 0x32f   :  { %v1582_v33 = vadd.f32 %v1581_v43, %v1580_v39 }
 0x333   :  { %v1412_v52 = vpop.f32.mrb[28].mxu0  ;;  %v1564_v53 = vpop.f32.mrb[24].mxu1 }
 0x334   :  { %v1583_v54 = vsel %vm1571_vm6, %v1412_v52, 0.0  ;;  %v1414_v55 = vpop.f32.mrb[29].mxu0  ;;  %v1566_v49 = vpop.f32.mrb[25].mxu1  ;;  %v1599_v11 = vsel %vm1571_vm6, %v1564_v53, 0.0 }
 0x335   :  { %v1584_v56 = vadd.f32 %v1583_v54, %v1582_v33  ;;  %v1415_v57 = vpop.f32.mrb[30].mxu0  ;;  %v1567_v37 = vpop.f32.mrb[26].mxu1 }
 0x336   :  { %v1585_v14 = vsel %vm1571_vm6, %v1415_v57, 0.0  ;;  %v1417_v26 = vpop.f32.mrb[31].mxu0  ;;  %v1569_v27 = vpop.f32.mrb[27].mxu1  ;;  %v1601_v6 = vsel %vm1571_vm6, %v1567_v37, 0.0 }
 0x337   :  { %v1586_v15 = vadd.f32 %v1585_v14, %v1584_v56 }
 0x339   :  { %v1588_v58 = vadd.f32 %v1587_v46, %v1586_v15 }
 0x33b   :  { %v1590_v50 = vadd.f32 %v1589_v9, %v1588_v58 }
 0x33d   :  { %v1592_v30 = vadd.f32 %v1591_v59, %v1590_v50 }
 0x33f   :  { %v1594_v61 = vadd.f32 %v1593_v60, %v1592_v30 }
 0x341   :  { %v1596_v63 = vadd.f32 %v1595_v62, %v1594_v61 }
 0x343   :  { %v1598_v2 = vadd.f32 %v1597_v0, %v1596_v63 }
 0x345   :  { %v1600_v3 = vadd.f32 %v1599_v11, %v1598_v2 }
 0x347   :  { %v1602_v7 = vadd.f32 %v1601_v6, %v1600_v3 }
 0x349   :  { %v1603_v16 = vrot.slane %v1602_v7, 4 }
 0x34b   :  { %v1604_v17 = vadd.f32 %v1603_v16, %v1602_v7 }
 0x34d   :  { %v1605_v18 = vrot.slane %v1604_v17, 2 }
 0x34f   :  { %v1606_v19 = vadd.f32 %v1605_v18, %v1604_v17 }
 0x351   :  { %v1607_v20 = vrot.slane %v1606_v19, 1 }
 0x353   :  { %v1608_v25 = vadd.f32 %v1607_v20, %v1606_v19 }
 0x355   :  { %v1609_v34 = vmul.f32 0.0078125, %v1608_v25 }
 0x357   :  { %v3779_v23 = vsub.f32 %v3693_v8, %v1609_v34  ;;  %v3782_v28 = vsub.f32 %v3703_v1, %v1609_v34  ;;  %v3785_v31 = vsub.f32 %v3720_v4, %v1609_v34  ;;  %v3788_v35 = vsub.f32 %v3735_v21, %v1609_v34 }
 0x358   :  { %v3791_v32 = vsub.f32 %v3747_v24, %v1609_v34  ;;  %v3793_v12 = vsub.f32 %v1407_v40, %v1609_v34  ;;  %v3795_v29 = vsub.f32 %v1412_v52, %v1609_v34  ;;  %v3797_v36 = vsub.f32 %v1415_v57, %v1609_v34 }
 0x359   :  { %v3800_v8 = vsub.f32 %v3695_v48, %v1609_v34  ;;  %v3803_v1 = vsub.f32 %v3705_v10, %v1609_v34  ;;  %v3806_v4 = vsub.f32 %v3722_v5, %v1609_v34  ;;  %v3809_v21 = vsub.f32 %v3737_v22, %v1609_v34 }
 0x35a   :  { %v3812_v24 = vsub.f32 %v3749_v38, %v1609_v34  ;;  %v3815_v39 = vsub.f32 %v3756_v13, %v1609_v34  ;;  %v3817_v40 = vsub.f32 %v1564_v53, %v1609_v34  ;;  %v3819_v41 = vsub.f32 %v1567_v37, %v1609_v34 }
 0x35b   :  { %v1626_v48 = vmul.f32 %v3779_v23, %v3779_v23  ;;  %v1627_v10 = vmul.f32 %v3782_v28, %v3782_v28  ;;  %v1628_v5 = vmul.f32 %v3785_v31, %v3785_v31  ;;  %v1629_v22 = vmul.f32 %v3788_v35, %v3788_v35 }
 0x35c   :  { %v1630_v44 = vmul.f32 %v3791_v32, %v3791_v32  ;;  %v1631_v47 = vmul.f32 %v3793_v12, %v3793_v12  ;;  %v1632_v53 = vmul.f32 %v3795_v29, %v3795_v29  ;;  %v1633_v49 = vmul.f32 %v3797_v36, %v3797_v36 }
 0x35d   :  { %v1642_v38 = vsel %vm1571_vm6, %v1626_v48, 0.0  ;;  %v1643_v13 = vsel %vm1571_vm6, %v1627_v10, 0.0  ;;  %v1645_v45 = vsel %vm1571_vm6, %v1628_v5, 0.0  ;;  %v1647_v51 = vsel %vm1571_vm6, %v1629_v22, 0.0 }
 0x35e   :  { %v1644_v43 = vadd.f32 %v1643_v13, %v1642_v38  ;;  %v1649_v54 = vsel %vm1571_vm6, %v1630_v44, 0.0  ;;  %v1651_v56 = vsel %vm1571_vm6, %v1631_v47, 0.0  ;;  %v1634_v37 = vmul.f32 %v3800_v8, %v3800_v8 }
 0x35f   :  { %v1653_v14 = vsel %vm1571_vm6, %v1632_v53, 0.0  ;;  %v1635_v27 = vmul.f32 %v3803_v1, %v3803_v1  ;;  %v1655_v15 = vsel %vm1571_vm6, %v1633_v49, 0.0  ;;  %v1636_v58 = vmul.f32 %v3806_v4, %v3806_v4 }
 0x360   :  { %v1646_v33 = vadd.f32 %v1645_v45, %v1644_v43  ;;  %v1657_v9 = vsel %vm1571_vm6, %v1634_v37, 0.0  ;;  %v1637_v59 = vmul.f32 %v3809_v21, %v3809_v21  ;;  %v1638_v61 = vmul.f32 %v3812_v24, %v3812_v24  ;;  %v1680_v45 = vld [vmem:[%s4730_s9] sm:$0x1] }
 0x361   :  { %v1659_v30 = vsel %vm1571_vm6, %v1635_v27, 0.0  ;;  %v1661_v62 = vsel %vm1571_vm6, %v1636_v58, 0.0  ;;  %v1639_v0 = vmul.f32 %v3815_v39, %v3815_v39  ;;  %v1640_v3 = vmul.f32 %v3817_v40, %v3817_v40 }
 0x362   :  { %v1648_v52 = vadd.f32 %v1647_v51, %v1646_v33  ;;  %v1663_v2 = vsel %vm1571_vm6, %v1637_v59, 0.0  ;;  %v1665_v6 = vsel %vm1571_vm6, %v1638_v61, 0.0  ;;  %v1641_v16 = vmul.f32 %v3819_v41, %v3819_v41 }
 0x363   :  { %v1667_v17 = vsel %vm1571_vm6, %v1639_v0, 0.0  ;;  %v1669_v19 = vsel %vm1571_vm6, %v1640_v3, 0.0  ;;  %v3883_v53 = vstv %s4732_s11 }
 0x364   :  { %v1650_v55 = vadd.f32 %v1649_v54, %v1648_v52  ;;  %v1671_v25 = vsel %vm1571_vm6, %v1641_v16, 0.0  ;;  %v3878_v52 = vld [vmem:[%s4731_s10] ss:$0 sm:$0xff] }
 0x366   :  { %v1652_v57 = vadd.f32 %v1651_v56, %v1650_v55 }
 0x368   :  { %v1654_v26 = vadd.f32 %v1653_v14, %v1652_v57 }
 0x36a   :  { %v1656_v46 = vadd.f32 %v1655_v15, %v1654_v26 }
 0x36c   :  { %v1658_v50 = vadd.f32 %v1657_v9, %v1656_v46 }
 0x36e   :  { %v1660_v60 = vadd.f32 %v1659_v30, %v1658_v50 }
 0x370   :  { %v1662_v63 = vadd.f32 %v1661_v62, %v1660_v60 }
 0x372   :  { %v1664_v11 = vadd.f32 %v1663_v2, %v1662_v63 }
 0x374   :  { %v1666_v7 = vadd.f32 %v1665_v6, %v1664_v11 }
 0x376   :  { %v1668_v18 = vadd.f32 %v1667_v17, %v1666_v7 }
 0x378   :  { %v1670_v20 = vadd.f32 %v1669_v19, %v1668_v18 }
 0x37a   :  { %v1672_v34 = vadd.f32 %v1671_v25, %v1670_v20 }
 0x37c   :  { %v1673_v48 = vrot.slane %v1672_v34, 4 }
 0x37e   :  { %v1674_v10 = vadd.f32 %v1673_v48, %v1672_v34 }
 0x380   :  { %v1675_v5 = vrot.slane %v1674_v10, 2 }
 0x382   :  { %v1676_v22 = vadd.f32 %v1675_v5, %v1674_v10 }
 0x384   :  { %v1677_v38 = vrot.slane %v1676_v22, 1 }
 0x386   :  { %v1678_v13 = vadd.f32 %v1677_v38, %v1676_v22 }
 0x388   :  { %v1679_v43 = vmul.f32 0.0078125, %v1678_v13 }
 0x38a   :  { %v1681_v44 = vadd.f32 1e-05, %v1679_v43 }
 0x38c   :  { %3001 = vrsqrt.f32 %v1681_v44 }
 0x396   :  { %v3002_v33 = vpop.eup %3001 }
 0x397   :  { %v1683_v47 = vmul.f32 %v3002_v33, %v1680_v45 }
 0x399   :  { %v3873_v51 = vrot.slane %v1683_v47, %v3594_v42 }
 0x39b   :  { %v1705_v54 = vmul.f32 %v3873_v51, %v3819_v41  ;;  %v1690_v55 = vmul.f32 %v3873_v51, %v3779_v23  ;;  %v1691_v49 = vmul.f32 %v3873_v51, %v3782_v28  ;;  %v1692_v56 = vmul.f32 %v3873_v51, %v3785_v31 }
 0x39c   :  { %v1693_v57 = vmul.f32 %v3873_v51, %v3788_v35  ;;  %v1694_v37 = vmul.f32 %v3873_v51, %v3791_v32  ;;  %v1695_v14 = vmul.f32 %v3873_v51, %v3793_v12  ;;  %v1696_v41 = vmul.f32 %v3873_v51, %v3795_v29 }
 0x39d   :  { %v3902_v23 = vadd.f32 %v3878_v52, %v1705_v54  ;;  %v1713_v28 = vadd.f32 %v3878_v52, %v1690_v55  ;;  %v1714_v26 = vadd.f32 %v3878_v52, %v1691_v49  ;;  %v1715_v31 = vadd.f32 %v3878_v52, %v1692_v56 }
 0x39e   :  { %v1716_v35 = vadd.f32 %v3878_v52, %v1693_v57  ;;  %v1717_v27 = vadd.f32 %v3878_v52, %v1694_v37  ;;  %v1718_v32 = vadd.f32 %v3878_v52, %v1695_v14  ;;  %v1697_v12 = vmul.f32 %v3873_v51, %v3797_v36 }
 0x39f   :  { %v3914_v29 = vmul.f32 %v3883_v53, %v3902_v23  ;;  %vm1730_vm7 = vcmp.ge.f32.partialorder %v1713_v28, 0.0  ;;  %vm1731_vm8 = vcmp.ge.f32.partialorder %v1714_v26, 0.0  ;;  %v1747_v15 = vmul.f32 %v3883_v53, %v1713_v28 }
 0x3a0   :  { %v1748_v46 = vmul.f32 %v3883_v53, %v1714_v26  ;;  %vm1732_vm9 = vcmp.ge.f32.partialorder %v1715_v31, 0.0  ;;  %vm1733_vm10 = vcmp.ge.f32.partialorder %v1716_v35, 0.0  ;;  %v1749_v58 = vmul.f32 %v3883_v53, %v1715_v31 }
 0x3a1   :  { %v1750_v9 = vmul.f32 %v3883_v53, %v1716_v35  ;;  %vm1734_vm11 = vcmp.ge.f32.partialorder %v1717_v27, 0.0  ;;  %vm1735_vm12 = vcmp.ge.f32.partialorder %v1718_v32, 0.0  ;;  %v1763_v50 = vsel %vm1730_vm7, %v1713_v28, %v1747_v15 }
 0x3a2   :  { %v1764_v36 = vsel %vm1731_vm8, %v1714_v26, %v1748_v46  ;;  %v1751_v59 = vmul.f32 %v3883_v53, %v1717_v27  ;;  %v1752_v30 = vmul.f32 %v3883_v53, %v1718_v32  ;;  %v1765_v61 = vsel %vm1732_vm9, %v1715_v31, %v1749_v58 }
 0x3a3   :  { %v1779_v60 = vpack.c.bf16 %v1764_v36, %v1763_v50  ;;  %v1766_v62 = vsel %vm1733_vm10, %v1716_v35, %v1750_v9  ;;  %v1719_v63 = vadd.f32 %v3878_v52, %v1696_v41  ;;  %v1720_v3 = vadd.f32 %v3878_v52, %v1697_v12 }
 0x3a4   :  { %v1780_v0 = vpack.c.bf16 %v1766_v62, %v1765_v61  ;;  %v1767_v2 = vsel %vm1734_vm11, %v1717_v27, %v1751_v59  ;;  %v1768_v11 = vsel %vm1735_vm12, %v1718_v32, %v1752_v30  ;;  %v1698_v16 = vmul.f32 %v3873_v51, %v3800_v8 }
 0x3a5   :  { %2751 = vmatprep.mubr.msk.bf16.mxu0 %vm1571_vm6, %v1779_v60  ;;  %2779 = vmatprep.mubr.msk.bf16.mxu1 %vm1571_vm6, %v1779_v60  ;;  %v1781_v6 = vpack.c.bf16 %v1768_v11, %v1767_v2  ;;  %vm1736_vm13 = vcmp.ge.f32.partialorder %v1719_v63, 0.0  ;;  %v1753_v7 = vmul.f32 %v3883_v53, %v1719_v63  ;;  %vm1737_vm14 = vcmp.ge.f32.partialorder %v1720_v3, 0.0 }
 0x3a6   :  { %2752 = vmatmul.mubr.msk.bf16.vlgmr.msra.gmra.mrb[32].mxu0 %vm1571_vm6, %v1780_v0  ;;  %2780 = vmatmul.mubr.msk.bf16.vlgmr.msra.gmra.mrb[28].mxu1 %vm1571_vm6, %v1780_v0  ;;  %v1754_v17 = vmul.f32 %v3883_v53, %v1720_v3  ;;  %v1699_v18 = vmul.f32 %v3873_v51, %v3803_v1  ;;  %v1700_v19 = vmul.f32 %v3873_v51, %v3806_v4  ;;  %vm1745_vm3 = vcmp.ge.f32.partialorder %v3902_v23, 0.0 }
 0x3a7   :  { %2755 = vmatprep.mubr.msk.bf16.mxu0 %vm1571_vm6, %v1781_v6  ;;  %2783 = vmatprep.mubr.msk.bf16.mxu1 %vm1571_vm6, %v1781_v6  ;;  %v1769_v20 = vsel %vm1736_vm13, %v1719_v63, %v1753_v7  ;;  %v1721_v8 = vadd.f32 %v3878_v52, %v1698_v16  ;;  %v1701_v25 = vmul.f32 %v3873_v51, %v3809_v21  ;;  %vm4739_vm8 = vcmask 343040  }
 0x3a8   :  { %v1770_v34 = vsel %vm1737_vm14, %v1720_v3, %v1754_v17  ;;  %v1722_v48 = vadd.f32 %v3878_v52, %v1699_v18  ;;  %v1723_v10 = vadd.f32 %v3878_v52, %v1700_v19  ;;  %v1702_v1 = vmul.f32 %v3873_v51, %v3812_v24 }
 0x3a9   :  { %v1782_v5 = vpack.c.bf16 %v1770_v34, %v1769_v20  ;;  %vm1738_vm15 = vcmp.ge.f32.partialorder %v1721_v8, 0.0  ;;  %v1755_v4 = vmul.f32 %v3883_v53, %v1721_v8  ;;  %v1724_v22 = vadd.f32 %v3878_v52, %v1701_v25 }
 0x3aa   :  { %vm1739_vm0 = vcmp.ge.f32.partialorder %v1722_v48, 0.0  ;;  %v1756_v38 = vmul.f32 %v3883_v53, %v1722_v48  ;;  %vm1740_vm1 = vcmp.ge.f32.partialorder %v1723_v10, 0.0  ;;  %v1757_v21 = vmul.f32 %v3883_v53, %v1723_v10 }
 0x3ab   :  { %v1771_v13 = vsel %vm1738_vm15, %v1721_v8, %v1755_v4  ;;  %vm1741_vm2 = vcmp.ge.f32.partialorder %v1724_v22, 0.0  ;;  %v1758_v43 = vmul.f32 %v3883_v53, %v1724_v22  ;;  %v1703_v44 = vmul.f32 %v3873_v51, %v3815_v39 }
 0x3ac   :  { %v1772_v24 = vsel %vm1739_vm0, %v1722_v48, %v1756_v38  ;;  %v1773_v45 = vsel %vm1740_vm1, %v1723_v10, %v1757_v21  ;;  %v1725_v33 = vadd.f32 %v3878_v52, %v1702_v1  ;;  %v1704_v47 = vmul.f32 %v3873_v51, %v3817_v40 }
 0x3ad   :  { %v1783_v54 = vpack.c.bf16 %v1772_v24, %v1771_v13  ;;  %v1774_v55 = vsel %vm1741_vm2, %v1724_v22, %v1758_v43  ;;  %v1726_v49 = vadd.f32 %v3878_v52, %v1703_v44  ;;  %v1778_v14 = vsel %vm1745_vm3, %v3902_v23, %v3914_v29 }
 0x3ae   :  { %2756 = vmatmul.mubr.msk.bf16.gmra.mrb[36].mxu0 %vm1571_vm6, %v1782_v5  ;;  %2784 = vmatmul.mubr.msk.bf16.gmra.mrb[32].mxu1 %vm1571_vm6, %v1782_v5  ;;  %v1784_v56 = vpack.c.bf16 %v1774_v55, %v1773_v45  ;;  %vm1742_vm5 = vcmp.ge.f32.partialorder %v1725_v33, 0.0  ;;  %v1759_v39 = vmul.f32 %v3883_v53, %v1725_v33  ;;  %v1727_v57 = vadd.f32 %v3878_v52, %v1704_v47 }
 0x3af   :  { %2759 = vmatprep.mubr.msk.bf16.mxu0 %vm1571_vm6, %v1783_v54  ;;  %2787 = vmatprep.mubr.msk.bf16.mxu1 %vm1571_vm6, %v1783_v54  ;;  %vm1743_vm4 = vcmp.ge.f32.partialorder %v1726_v49, 0.0  ;;  %v1760_v40 = vmul.f32 %v3883_v53, %v1726_v49 }
 0x3b0   :  { %v1775_v51 = vsel %vm1742_vm5, %v1725_v33, %v1759_v39  ;;  %vm1744_vm7 = vcmp.ge.f32.partialorder %v1727_v57, 0.0  ;;  %v1761_v37 = vmul.f32 %v3883_v53, %v1727_v57 }
 0x3b1   :  { %v1776_v41 = vsel %vm1743_vm4, %v1726_v49, %v1760_v40 }
 0x3b2   :  { %v1785_v28 = vpack.c.bf16 %v1776_v41, %v1775_v51  ;;  %v1777_v26 = vsel %vm1744_vm7, %v1727_v57, %v1761_v37 }
 0x3b3   :  { %v1786_v52 = vpack.c.bf16 %v1778_v14, %v1777_v26 }
 0x3b6   :  { %2760 = vmatmul.mubr.msk.bf16.gmra.mrb[40].mxu0 %vm1571_vm6, %v1784_v56  ;;  %2788 = vmatmul.mubr.msk.bf16.gmra.mrb[36].mxu1 %vm1571_vm6, %v1784_v56 }
 0x3b7   :  { %2763 = vmatprep.mubr.msk.bf16.mxu0 %vm1571_vm6, %v1785_v28  ;;  %2791 = vmatprep.mubr.msk.bf16.mxu1 %vm1571_vm6, %v1785_v28 }
 0x3be   :  { %2764 = vmatmul.mubr.msk.bf16.gmra.mrb[44].mxu0 %vm1571_vm6, %v1786_v52  ;;  %2792 = vmatmul.mubr.msk.bf16.gmra.mrb[40].mxu1 %vm1571_vm6, %v1786_v52 }
 0x479   :  { %v3975_v53 = vpop.f32.mrb[32].mxu0  ;;  %v3977_v31 = vpop.f32.mrb[28].mxu1 }
 0x47a   :  { %v3979_v23 = vpop.f32.mrb[33].mxu0  ;;  %v3981_v35 = vpop.f32.mrb[29].mxu1  ;;  %v2104_v9 = vsel %vm4739_vm8, %v3975_v53, 0.0 }
 0x47b   :  { %v3983_v27 = vpop.f32.mrb[34].mxu0  ;;  %v3985_v32 = vpop.f32.mrb[30].mxu1  ;;  %v2101_v15 = vsel %vm4739_vm8, %v3979_v23, 0.0 }
 0x47c   :  { %v3987_v12 = vpop.f32.mrb[35].mxu0  ;;  %v3989_v29 = vpop.f32.mrb[31].mxu1  ;;  %v2106_v36 = vsel %vm4739_vm8, %v3983_v27, 0.0 }
 0x47d   :  { %v2102_v46 = vsel %vm4739_vm8, %v3987_v12, 0.0 }
 0x47e   :  { %v2103_v58 = vadd.f32 %v2102_v46, %v2101_v15  ;;  %v2132_v15 = vsel %vm4739_vm8, %v3981_v35, 0.0 }
 0x480   :  { %v2105_v50 = vadd.f32 %v2104_v9, %v2103_v58  ;;  %v2134_v58 = vsel %vm4739_vm8, %v3989_v29, 0.0 }
 0x481   :  { %v3999_v59 = vpop.f32.mrb[36].mxu0  ;;  %v4001_v30 = vpop.f32.mrb[32].mxu1 }
 0x482   :  { %v4003_v60 = vpop.f32.mrb[37].mxu0  ;;  %v2107_v61 = vadd.f32 %v2106_v36, %v2105_v50  ;;  %v4005_v62 = vpop.f32.mrb[33].mxu1  ;;  %v2112_v17 = vsel %vm4739_vm8, %v3999_v59, 0.0  ;;  %v2136_v50 = vsel %vm4739_vm8, %v3977_v31, 0.0 }
 0x483   :  { %v2108_v63 = vsel %vm4739_vm8, %v4003_v60, 0.0  ;;  %v4009_v0 = vpop.f32.mrb[38].mxu0  ;;  %v4011_v2 = vpop.f32.mrb[34].mxu1 }
 0x484   :  { %v2109_v11 = vadd.f32 %v2108_v63, %v2107_v61  ;;  %v4013_v3 = vpop.f32.mrb[39].mxu0  ;;  %v4015_v6 = vpop.f32.mrb[35].mxu1  ;;  %v2114_v19 = vsel %vm4739_vm8, %v4009_v0, 0.0  ;;  %v2138_v61 = vsel %vm4739_vm8, %v3985_v32, 0.0 }
 0x485   :  { %v2110_v7 = vsel %vm4739_vm8, %v4013_v3, 0.0 }
 0x486   :  { %v2111_v16 = vadd.f32 %v2110_v7, %v2109_v11  ;;  %v2140_v11 = vsel %vm4739_vm8, %v4005_v62, 0.0 }
 0x488   :  { %v2113_v18 = vadd.f32 %v2112_v17, %v2111_v16  ;;  %v2142_v16 = vsel %vm4739_vm8, %v4015_v6, 0.0 }
 0x489   :  { %v4023_v20 = vpop.f32.mrb[40].mxu0  ;;  %v4025_v8 = vpop.f32.mrb[36].mxu1 }
 0x48a   :  { %v4027_v25 = vpop.f32.mrb[41].mxu0  ;;  %v2115_v34 = vadd.f32 %v2114_v19, %v2113_v18  ;;  %v4029_v48 = vpop.f32.mrb[37].mxu1  ;;  %v2120_v43 = vsel %vm4739_vm8, %v4023_v20, 0.0  ;;  %v2144_v18 = vsel %vm4739_vm8, %v4001_v30, 0.0 }
 0x48b   :  { %v2116_v10 = vsel %vm4739_vm8, %v4027_v25, 0.0  ;;  %v4033_v1 = vpop.f32.mrb[42].mxu0  ;;  %v4035_v5 = vpop.f32.mrb[38].mxu1 }
 0x48c   :  { %v2117_v4 = vadd.f32 %v2116_v10, %v2115_v34  ;;  %v4037_v22 = vpop.f32.mrb[43].mxu0  ;;  %v4039_v38 = vpop.f32.mrb[39].mxu1  ;;  %v2122_v24 = vsel %vm4739_vm8, %v4033_v1, 0.0  ;;  %v2146_v34 = vsel %vm4739_vm8, %v4011_v2, 0.0 }
 0x48d   :  { %v2118_v21 = vsel %vm4739_vm8, %v4037_v22, 0.0 }
 0x48e   :  { %v2119_v13 = vadd.f32 %v2118_v21, %v2117_v4  ;;  %v2148_v4 = vsel %vm4739_vm8, %v4029_v48, 0.0 }
 0x490   :  { %v2121_v44 = vadd.f32 %v2120_v43, %v2119_v13  ;;  %v2150_v13 = vsel %vm4739_vm8, %v4039_v38, 0.0 }
 0x491   :  { %v4047_v45 = vpop.f32.mrb[44].mxu0  ;;  %v4049_v33 = vpop.f32.mrb[40].mxu1 }
 0x492   :  { %v4051_v47 = vpop.f32.mrb[45].mxu0  ;;  %v2123_v54 = vadd.f32 %v2122_v24, %v2121_v44  ;;  %v4053_v55 = vpop.f32.mrb[41].mxu1  ;;  %v2128_v41 = vsel %vm4739_vm8, %v4047_v45, 0.0  ;;  %v2152_v44 = vsel %vm4739_vm8, %v4025_v8, 0.0 }
 0x493   :  { %v2124_v49 = vsel %vm4739_vm8, %v4051_v47, 0.0  ;;  %v4057_v56 = vpop.f32.mrb[46].mxu0  ;;  %v4059_v39 = vpop.f32.mrb[42].mxu1 }
 0x494   :  { %v2125_v57 = vadd.f32 %v2124_v49, %v2123_v54  ;;  %v1944_v40 = vpop.f32.mrb[47].mxu0  ;;  %v4061_v51 = vpop.f32.mrb[43].mxu1  ;;  %v2130_v26 = vsel %vm4739_vm8, %v4057_v56, 0.0  ;;  %v2154_v54 = vsel %vm4739_vm8, %v4035_v5, 0.0 }
 0x495   :  { %v2126_v37 = vsel %vm4739_vm8, %v1944_v40, 0.0 }
 0x496   :  { %v2127_v14 = vadd.f32 %v2126_v37, %v2125_v57  ;;  %v2156_v57 = vsel %vm4739_vm8, %v4053_v55, 0.0 }
 0x498   :  { %v2129_v28 = vadd.f32 %v2128_v41, %v2127_v14  ;;  %v2158_v14 = vsel %vm4739_vm8, %v4061_v51, 0.0 }
 0x49a   :  { %v2131_v52 = vadd.f32 %v2130_v26, %v2129_v28  ;;  %v2160_v28 = vsel %vm4739_vm8, %v4049_v33, 0.0 }
 0x49c   :  { %v2133_v46 = vadd.f32 %v2132_v15, %v2131_v52  ;;  %v2162_v52 = vsel %vm4739_vm8, %v4059_v39, 0.0 }
 0x49e   :  { %v2135_v9 = vadd.f32 %v2134_v58, %v2133_v46 }
 0x4a0   :  { %v2137_v36 = vadd.f32 %v2136_v50, %v2135_v9 }
 0x4a2   :  { %v2139_v63 = vadd.f32 %v2138_v61, %v2137_v36 }
 0x4a4   :  { %v2141_v7 = vadd.f32 %v2140_v11, %v2139_v63 }
 0x4a6   :  { %v2143_v17 = vadd.f32 %v2142_v16, %v2141_v7 }
 0x4a8   :  { %v2145_v19 = vadd.f32 %v2144_v18, %v2143_v17 }
 0x4aa   :  { %v2147_v10 = vadd.f32 %v2146_v34, %v2145_v19 }
 0x4ac   :  { %v2149_v21 = vadd.f32 %v2148_v4, %v2147_v10 }
 0x4ae   :  { %v2151_v43 = vadd.f32 %v2150_v13, %v2149_v21 }
 0x4b0   :  { %v2153_v24 = vadd.f32 %v2152_v44, %v2151_v43 }
 0x4b2   :  { %v2155_v49 = vadd.f32 %v2154_v54, %v2153_v24 }
 0x4b4   :  { %v2157_v37 = vadd.f32 %v2156_v57, %v2155_v49 }
 0x4b6   :  { %v2159_v41 = vadd.f32 %v2158_v14, %v2157_v37 }
 0x4b8   :  { %v2161_v26 = vadd.f32 %v2160_v28, %v2159_v41 }
 0x4ba   :  { %v2163_v15 = vadd.f32 %v2162_v52, %v2161_v26 }
 0x4bc   :  { %v2164_v46 = vrot.slane %v2163_v15, 4 }
 0x4be   :  { %v2165_v58 = vadd.f32 %v2164_v46, %v2163_v15 }
 0x4c0   :  { %v2166_v9 = vrot.slane %v2165_v58, 2 }
 0x4c2   :  { %v2167_v50 = vadd.f32 %v2166_v9, %v2165_v58 }
 0x4c4   :  { %v2168_v36 = vrot.slane %v2167_v50, 1 }
 0x4c6   :  { %v2169_v61 = vadd.f32 %v2168_v36, %v2167_v50 }
 0x4c8   :  { %v2170_v63 = vmul.f32 0.00390625, %v2169_v61 }
 0x4ca   :  { %v4101_v11 = vsub.f32 %v3979_v23, %v2170_v63  ;;  %v4104_v7 = vsub.f32 %v3987_v12, %v2170_v63  ;;  %v4107_v16 = vsub.f32 %v3975_v53, %v2170_v63  ;;  %v4110_v17 = vsub.f32 %v3983_v27, %v2170_v63 }
 0x4cb   :  { %v4113_v18 = vsub.f32 %v4003_v60, %v2170_v63  ;;  %v4116_v19 = vsub.f32 %v4013_v3, %v2170_v63  ;;  %v4119_v34 = vsub.f32 %v3999_v59, %v2170_v63  ;;  %v4122_v23 = vsub.f32 %v4009_v0, %v2170_v63 }
 0x4cc   :  { %v4125_v12 = vsub.f32 %v4027_v25, %v2170_v63  ;;  %v4128_v53 = vsub.f32 %v4037_v22, %v2170_v63  ;;  %v4131_v27 = vsub.f32 %v4023_v20, %v2170_v63  ;;  %v4134_v60 = vsub.f32 %v4033_v1, %v2170_v63 }
 0x4cd   :  { %v4137_v3 = vsub.f32 %v4051_v47, %v2170_v63  ;;  %v4139_v59 = vsub.f32 %v1944_v40, %v2170_v63  ;;  %v4142_v0 = vsub.f32 %v4047_v45, %v2170_v63  ;;  %v4145_v25 = vsub.f32 %v4057_v56, %v2170_v63 }
 0x4ce   :  { %v4148_v22 = vsub.f32 %v3981_v35, %v2170_v63  ;;  %v4151_v20 = vsub.f32 %v3989_v29, %v2170_v63  ;;  %v4154_v1 = vsub.f32 %v3977_v31, %v2170_v63  ;;  %v4157_v47 = vsub.f32 %v3985_v32, %v2170_v63 }
 0x4cf   :  { %v4160_v40 = vsub.f32 %v4005_v62, %v2170_v63  ;;  %v4163_v45 = vsub.f32 %v4015_v6, %v2170_v63  ;;  %v4166_v56 = vsub.f32 %v4001_v30, %v2170_v63  ;;  %v4169_v35 = vsub.f32 %v4011_v2, %v2170_v63 }
 0x4d0   :  { %v4172_v29 = vsub.f32 %v4029_v48, %v2170_v63  ;;  %v4175_v31 = vsub.f32 %v4039_v38, %v2170_v63  ;;  %v4178_v32 = vsub.f32 %v4025_v8, %v2170_v63  ;;  %v4181_v62 = vsub.f32 %v4035_v5, %v2170_v63 }
 0x4d1   :  { %v4184_v6 = vsub.f32 %v4053_v55, %v2170_v63  ;;  %v4187_v30 = vsub.f32 %v4061_v51, %v2170_v63  ;;  %v4190_v2 = vsub.f32 %v4049_v33, %v2170_v63  ;;  %v4193_v48 = vsub.f32 %v4059_v39, %v2170_v63 }
 0x4d2   :  { %v2203_v38 = vmul.f32 %v4101_v11, %v4101_v11  ;;  %v2204_v8 = vmul.f32 %v4104_v7, %v4104_v7  ;;  %v2205_v5 = vmul.f32 %v4107_v16, %v4107_v16  ;;  %v2206_v55 = vmul.f32 %v4110_v17, %v4110_v17 }
 0x4d3   :  { %v2207_v39 = vmul.f32 %v4113_v18, %v4113_v18  ;;  %v2208_v13 = vmul.f32 %v4116_v19, %v4116_v19  ;;  %v2209_v24 = vmul.f32 %v4119_v34, %v4119_v34  ;;  %v2210_v57 = vmul.f32 %v4122_v23, %v4122_v23 }
 0x4d4   :  { %v2235_v51 = vsel %vm4739_vm8, %v2203_v38, 0.0  ;;  %v2236_v33 = vsel %vm4739_vm8, %v2204_v8, 0.0  ;;  %v2238_v4 = vsel %vm4739_vm8, %v2205_v5, 0.0  ;;  %v2240_v43 = vsel %vm4739_vm8, %v2206_v55, 0.0 }
 0x4d5   :  { %v2237_v10 = vadd.f32 %v2236_v33, %v2235_v51  ;;  %v2242_v54 = vsel %vm4739_vm8, %v2207_v39, 0.0  ;;  %v2244_v37 = vsel %vm4739_vm8, %v2208_v13, 0.0  ;;  %v2211_v41 = vmul.f32 %v4125_v12, %v4125_v12 }
 0x4d6   :  { %v2246_v28 = vsel %vm4739_vm8, %v2209_v24, 0.0  ;;  %v2212_v52 = vmul.f32 %v4128_v53, %v4128_v53  ;;  %v2248_v15 = vsel %vm4739_vm8, %v2210_v57, 0.0  ;;  %v2213_v58 = vmul.f32 %v4131_v27, %v4131_v27 }
 0x4d7   :  { %v2239_v21 = vadd.f32 %v2238_v4, %v2237_v10  ;;  %v2250_v9 = vsel %vm4739_vm8, %v2211_v41, 0.0  ;;  %v2214_v36 = vmul.f32 %v4134_v60, %v4134_v60  ;;  %v2215_v38 = vmul.f32 %v4137_v3, %v4137_v3 }
 0x4d8   :  { %v2252_v61 = vsel %vm4739_vm8, %v2212_v52, 0.0  ;;  %v2254_v8 = vsel %vm4739_vm8, %v2213_v58, 0.0  ;;  %v2216_v55 = vmul.f32 %v4139_v59, %v4139_v59  ;;  %v2217_v10 = vmul.f32 %v4142_v0, %v4142_v0 }
 0x4d9   :  { %v2241_v44 = vadd.f32 %v2240_v43, %v2239_v21  ;;  %v2256_v51 = vsel %vm4739_vm8, %v2214_v36, 0.0  ;;  %v2258_v39 = vsel %vm4739_vm8, %v2215_v38, 0.0  ;;  %v2218_v21 = vmul.f32 %v4145_v25, %v4145_v25 }
 0x4da   :  { %v2260_v13 = vsel %vm4739_vm8, %v2216_v55, 0.0  ;;  %v2262_v24 = vsel %vm4739_vm8, %v2217_v10, 0.0 }
 0x4db   :  { %v2243_v49 = vadd.f32 %v2242_v54, %v2241_v44  ;;  %v2219_v44 = vmul.f32 %v4148_v22, %v4148_v22  ;;  %v2264_v57 = vsel %vm4739_vm8, %v2218_v21, 0.0 }
 0x4dd   :  { %v2245_v14 = vadd.f32 %v2244_v37, %v2243_v49  ;;  %v2220_v49 = vmul.f32 %v4151_v20, %v4151_v20  ;;  %v2266_v41 = vsel %vm4739_vm8, %v2219_v44, 0.0 }
 0x4df   :  { %v2247_v26 = vadd.f32 %v2246_v28, %v2245_v14  ;;  %v2221_v14 = vmul.f32 %v4154_v1, %v4154_v1  ;;  %v2268_v52 = vsel %vm4739_vm8, %v2220_v49, 0.0 }
 0x4e1   :  { %v2249_v46 = vadd.f32 %v2248_v15, %v2247_v26  ;;  %v2222_v26 = vmul.f32 %v4157_v47, %v4157_v47  ;;  %v2270_v58 = vsel %vm4739_vm8, %v2221_v14, 0.0 }
 0x4e3   :  { %v2251_v50 = vadd.f32 %v2250_v9, %v2249_v46  ;;  %v2223_v46 = vmul.f32 %v4160_v40, %v4160_v40  ;;  %v2272_v36 = vsel %vm4739_vm8, %v2222_v26, 0.0 }
 0x4e5   :  { %v2253_v63 = vadd.f32 %v2252_v61, %v2251_v50  ;;  %v2224_v50 = vmul.f32 %v4163_v45, %v4163_v45  ;;  %v2274_v38 = vsel %vm4739_vm8, %v2223_v46, 0.0 }
 0x4e7   :  { %v2255_v5 = vadd.f32 %v2254_v8, %v2253_v63  ;;  %v2225_v63 = vmul.f32 %v4166_v56, %v4166_v56  ;;  %v2276_v55 = vsel %vm4739_vm8, %v2224_v50, 0.0 }
 0x4e9   :  { %v2257_v33 = vadd.f32 %v2256_v51, %v2255_v5  ;;  %v2226_v5 = vmul.f32 %v4169_v35, %v4169_v35  ;;  %v2278_v10 = vsel %vm4739_vm8, %v2225_v63, 0.0 }
 0x4eb   :  { %v2259_v4 = vadd.f32 %v2258_v39, %v2257_v33  ;;  %v2227_v33 = vmul.f32 %v4172_v29, %v4172_v29  ;;  %v2280_v21 = vsel %vm4739_vm8, %v2226_v5, 0.0 }
 0x4ed   :  { %v2261_v43 = vadd.f32 %v2260_v13, %v2259_v4  ;;  %v2228_v4 = vmul.f32 %v4175_v31, %v4175_v31  ;;  %v2282_v44 = vsel %vm4739_vm8, %v2227_v33, 0.0 }
 0x4ef   :  { %v2263_v54 = vadd.f32 %v2262_v24, %v2261_v43  ;;  %v2229_v43 = vmul.f32 %v4178_v32, %v4178_v32  ;;  %v2284_v49 = vsel %vm4739_vm8, %v2228_v4, 0.0 }
 0x4f1   :  { %v2265_v37 = vadd.f32 %v2264_v57, %v2263_v54  ;;  %v2230_v54 = vmul.f32 %v4181_v62, %v4181_v62  ;;  %v2286_v14 = vsel %vm4739_vm8, %v2229_v43, 0.0 }
 0x4f3   :  { %v2267_v28 = vadd.f32 %v2266_v41, %v2265_v37  ;;  %v2231_v37 = vmul.f32 %v4184_v6, %v4184_v6  ;;  %v2288_v26 = vsel %vm4739_vm8, %v2230_v54, 0.0 }
 0x4f5   :  { %v2269_v15 = vadd.f32 %v2268_v52, %v2267_v28  ;;  %v2232_v28 = vmul.f32 %v4187_v30, %v4187_v30  ;;  %v2290_v46 = vsel %vm4739_vm8, %v2231_v37, 0.0 }
 0x4f7   :  { %v2271_v9 = vadd.f32 %v2270_v58, %v2269_v15  ;;  %v2233_v15 = vmul.f32 %v4190_v2, %v4190_v2  ;;  %v2292_v50 = vsel %vm4739_vm8, %v2232_v28, 0.0 }
 0x4f9   :  { %v2273_v61 = vadd.f32 %v2272_v36, %v2271_v9  ;;  %v2234_v9 = vmul.f32 %v4193_v48, %v4193_v48 }
 0x4fb   :  { %v2275_v8 = vadd.f32 %v2274_v38, %v2273_v61  ;;  %v2294_v61 = vsel %vm4739_vm8, %v2233_v15, 0.0  ;;  %v2296_v38 = vsel %vm4739_vm8, %v2234_v9, 0.0 }
 0x4fd   :  { %v2277_v51 = vadd.f32 %v2276_v55, %v2275_v8 }
 0x4ff   :  { %v2279_v39 = vadd.f32 %v2278_v10, %v2277_v51 }
 0x501   :  { %v2281_v13 = vadd.f32 %v2280_v21, %v2279_v39 }
 0x503   :  { %v2283_v24 = vadd.f32 %v2282_v44, %v2281_v13  ;;  %v2305_v13 = vld [vmem:[%s4733_s14] sm:$0x1] }
 0x505   :  { %v2285_v57 = vadd.f32 %v2284_v49, %v2283_v24 }
 0x507   :  { %v2287_v41 = vadd.f32 %v2286_v14, %v2285_v57 }
 0x509   :  { %v2289_v52 = vadd.f32 %v2288_v26, %v2287_v41 }
 0x50b   :  { %v2291_v58 = vadd.f32 %v2290_v46, %v2289_v52 }
 0x50d   :  { %v2293_v36 = vadd.f32 %v2292_v50, %v2291_v58 }
 0x50f   :  { %v2295_v63 = vadd.f32 %v2294_v61, %v2293_v36 }
 0x511   :  { %v2297_v8 = vadd.f32 %v2296_v38, %v2295_v63 }
 0x513   :  { %v2298_v5 = vrot.slane %v2297_v8, 4 }
 0x515   :  { %v2299_v55 = vadd.f32 %v2298_v5, %v2297_v8 }
 0x517   :  { %v2300_v51 = vrot.slane %v2299_v55, 2 }
 0x519   :  { %v2301_v33 = vadd.f32 %v2300_v51, %v2299_v55 }
 0x51b   :  { %v2302_v10 = vrot.slane %v2301_v33, 1 }
 0x51d   :  { %v2303_v39 = vadd.f32 %v2302_v10, %v2301_v33 }
 0x51f   :  { %v2304_v4 = vmul.f32 0.00390625, %v2303_v39 }
 0x521   :  { %v2306_v21 = vadd.f32 1e-05, %v2304_v4 }
 0x523   :  { %3003 = vrsqrt.f32 %v2306_v21 }
 0x52d   :  { %v3004_v43 = vpop.eup %3003 }
 0x52e   :  { %v2308_v44 = vmul.f32 %v3004_v43, %v2305_v13 }
 0x530   :  { %v2313_v24 = vrot.slane %v2308_v44, %v3594_v42 }
 0x532   :  { %v2334_v54 = vmul.f32 %v2313_v24, %v4157_v47  ;;  %v2335_v49 = vmul.f32 %v2313_v24, %v4160_v40  ;;  %v2336_v57 = vmul.f32 %v2313_v24, %v4163_v45  ;;  %v2337_v37 = vmul.f32 %v2313_v24, %v4166_v56 }
 0x533   :  { %v2338_v14 = vmul.f32 %v2313_v24, %v4169_v35  ;;  %v2339_v41 = vmul.f32 %v2313_v24, %v4172_v29  ;;  %v2340_v28 = vmul.f32 %v2313_v24, %v4175_v31  ;;  %v2341_v26 = vmul.f32 %v2313_v24, %v4178_v32 }
 0x534   :  { %v2342_v52 = vmul.f32 %v2313_v24, %v4181_v62  ;;  %v2343_v42 = vmul.f32 %v2313_v24, %v4184_v6  ;;  %v2344_v47 = vmul.f32 %v2313_v24, %v4187_v30  ;;  %v2345_v40 = vmul.f32 %v2313_v24, %v4190_v2 }
 0x535   :  { %v2346_v45 = vmul.f32 %v2313_v24, %v4193_v48  ;;  %v2315_v56 = vmul.f32 %v2313_v24, %v4101_v11  ;;  %v2316_v35 = vmul.f32 %v2313_v24, %v4104_v7  ;;  %v2317_v29 = vmul.f32 %v2313_v24, %v4107_v16  ;;  %v2689_v48 = vld [vmem:[%s4735_s15] ss:$0 sm:$0xff] }
 0x536   :  { %v4314_v31 = vstv %s4734_s16  ;;  %v2318_v32 = vmul.f32 %v2313_v24, %v4110_v17  ;;  %v2319_v62 = vmul.f32 %v2313_v24, %v4113_v18  ;;  %v2320_v6 = vmul.f32 %v2313_v24, %v4116_v19 }
 0x537   :  { %v2321_v30 = vmul.f32 %v2313_v24, %v4119_v34  ;;  %v2322_v2 = vmul.f32 %v2313_v24, %v4122_v23  ;;  %v2323_v11 = vmul.f32 %v2313_v24, %v4125_v12  ;;  %v2324_v7 = vmul.f32 %v2313_v24, %v4128_v53 }
 0x538   :  { %v2325_v16 = vmul.f32 %v2313_v24, %v4131_v27  ;;  %v2326_v17 = vmul.f32 %v2313_v24, %v4134_v60  ;;  %v2327_v18 = vmul.f32 %v2313_v24, %v4137_v3  ;;  %v2328_v19 = vmul.f32 %v2313_v24, %v4139_v59 }
 0x539   :  { %v2329_v34 = vmul.f32 %v2313_v24, %v4142_v0  ;;  %v2330_v23 = vmul.f32 %v2313_v24, %v4145_v25  ;;  %v2331_v12 = vmul.f32 %v2313_v24, %v4148_v22  ;;  %v2332_v53 = vmul.f32 %v2313_v24, %v4151_v20 }
 0x53a   :  { %v2333_v27 = vmul.f32 %v2313_v24, %v4154_v1  ;;  %v4335_v15 = vadd.f32 %v2689_v48, %v2315_v56  ;;  %v4337_v46 = vadd.f32 %v2689_v48, %v2316_v35  ;;  %v4339_v58 = vadd.f32 %v2689_v48, %v2317_v29 }
 0x53b   :  { %v4341_v60 = vadd.f32 %v2689_v48, %v2318_v32  ;;  %v4343_v3 = vadd.f32 %v2689_v48, %v2319_v62  ;;  %v4345_v59 = vadd.f32 %v2689_v48, %v2320_v6  ;;  %v4347_v0 = vadd.f32 %v2689_v48, %v2321_v30 }
 0x53c   :  { %v4349_v25 = vadd.f32 %v2689_v48, %v2322_v2  ;;  %v4351_v22 = vadd.f32 %v2689_v48, %v2323_v11  ;;  %v4353_v20 = vadd.f32 %v2689_v48, %v2324_v7  ;;  %v4355_v1 = vadd.f32 %v2689_v48, %v2325_v16 }
 0x53d   :  { %v4357_v9 = vadd.f32 %v2689_v48, %v2326_v17  ;;  %v4359_v50 = vadd.f32 %v2689_v48, %v2327_v18  ;;  %v4361_v36 = vadd.f32 %v2689_v48, %v2328_v19  ;;  %v4363_v61 = vadd.f32 %v2689_v48, %v2329_v34 }
 0x53e   :  { %v4365_v63 = vadd.f32 %v2689_v48, %v2330_v23  ;;  %v4367_v38 = vadd.f32 %v2689_v48, %v2331_v12  ;;  %v4369_v8 = vadd.f32 %v2689_v48, %v2332_v53  ;;  %v4371_v5 = vadd.f32 %v2689_v48, %v2333_v27 }
 0x53f   :  { %v4373_v55 = vadd.f32 %v2689_v48, %v2334_v54  ;;  %v4375_v51 = vadd.f32 %v2689_v48, %v2335_v49  ;;  %v4377_v33 = vadd.f32 %v2689_v48, %v2336_v57  ;;  %v4379_v10 = vadd.f32 %v2689_v48, %v2337_v37 }
 0x540   :  { %v4381_v39 = vadd.f32 %v2689_v48, %v2338_v14  ;;  %v4383_v4 = vadd.f32 %v2689_v48, %v2339_v41  ;;  %v4385_v21 = vadd.f32 %v2689_v48, %v2340_v28  ;;  %v4387_v13 = vadd.f32 %v2689_v48, %v2341_v26 }
 0x541   :  { %v4389_v43 = vadd.f32 %v2689_v48, %v2342_v52  ;;  %v4391_v44 = vadd.f32 %v2689_v48, %v2343_v42  ;;  %v4393_v24 = vadd.f32 %v2689_v48, %v2344_v47  ;;  %v4395_v54 = vadd.f32 %v2689_v48, %v2345_v40 }
 0x542   :  { %4754 = vst [vmem:[#allocation5_spill] sm:$0xff] %v4383_v4  ;;  %4755 = vst [vmem:[#allocation6_spill] sm:$0xff] %v4385_v21  ;;  %v4397_v49 = vadd.f32 %v2689_v48, %v2346_v45  ;;  %vm2387_vm6 = vcmp.ge.f32.partialorder %v4335_v15, 0.0  ;;  %vm2388_vm9 = vcmp.ge.f32.partialorder %v4337_v46, 0.0  ;;  %vm2389_vm10 = vcmp.ge.f32.partialorder %v4339_v58, 0.0 }
 0x543   :  { %4756 = vst [vmem:[#allocation7_spill] sm:$0xff] %v4389_v43  ;;  %4757 = vst [vmem:[#allocation8_spill] sm:$0xff] %v4391_v44  ;;  %vm2390_vm11 = vcmp.ge.f32.partialorder %v4341_v60, 0.0  ;;  %vm2391_vm12 = vcmp.ge.f32.partialorder %v4343_v3, 0.0  ;;  %vm2392_vm13 = vcmp.ge.f32.partialorder %v4345_v59, 0.0  ;;  %vm2393_vm14 = vcmp.ge.f32.partialorder %v4347_v0, 0.0 }
 0x544   :  { %4758 = vst [vmem:[#allocation9_spill] sm:$0xff] %v4393_v24  ;;  %vm2394_vm15 = vcmp.ge.f32.partialorder %v4349_v25, 0.0  ;;  %vm2395_vm0 = vcmp.ge.f32.partialorder %v4351_v22, 0.0  ;;  %vm2396_vm1 = vcmp.ge.f32.partialorder %v4353_v20, 0.0  ;;  %vm2397_vm2 = vcmp.ge.f32.partialorder %v4355_v1, 0.0 }
 0x545   :  { %vm2398_vm3 = vcmp.ge.f32.partialorder %v4357_v9, 0.0  ;;  %v2420_v57 = vmul.f32 %v4314_v31, %v4335_v15  ;;  %v2421_v37 = vmul.f32 %v4314_v31, %v4337_v46  ;;  %v2422_v14 = vmul.f32 %v4314_v31, %v4339_v58 }
 0x546   :  { %v2423_v41 = vmul.f32 %v4314_v31, %v4341_v60  ;;  %v2424_v28 = vmul.f32 %v4314_v31, %v4343_v3  ;;  %v2425_v26 = vmul.f32 %v4314_v31, %v4345_v59  ;;  %v2426_v52 = vmul.f32 %v4314_v31, %v4347_v0 }
 0x547   :  { %v2427_v42 = vmul.f32 %v4314_v31, %v4349_v25  ;;  %v2428_v47 = vmul.f32 %v4314_v31, %v4351_v22  ;;  %v2429_v40 = vmul.f32 %v4314_v31, %v4353_v20  ;;  %v2430_v45 = vmul.f32 %v4314_v31, %v4355_v1 }
 0x548   :  { %v2431_v56 = vmul.f32 %v4314_v31, %v4357_v9  ;;  %v2432_v35 = vmul.f32 %v4314_v31, %v4359_v50  ;;  %v2433_v29 = vmul.f32 %v4314_v31, %v4361_v36  ;;  %v2434_v32 = vmul.f32 %v4314_v31, %v4363_v61 }
 0x549   :  { %v2435_v62 = vmul.f32 %v4314_v31, %v4365_v63  ;;  %vm2415_vm5 = vcmp.ge.f32.partialorder %v4391_v44, 0.0  ;;  %vm2416_vm4 = vcmp.ge.f32.partialorder %v4393_v24, 0.0  ;;  %vm2417_vm7 = vcmp.ge.f32.partialorder %v4395_v54, 0.0 }
 0x54a   :  { %vm2418_vm8 = vcmp.ge.f32.partialorder %v4397_v49, 0.0  ;;  %v2436_v6 = vmul.f32 %v4314_v31, %v4367_v38  ;;  %v2437_v30 = vmul.f32 %v4314_v31, %v4369_v8  ;;  %v2438_v2 = vmul.f32 %v4314_v31, %v4371_v5 }
 0x54b   :  { %v2439_v11 = vmul.f32 %v4314_v31, %v4373_v55  ;;  %v2440_v7 = vmul.f32 %v4314_v31, %v4375_v51  ;;  %v2441_v16 = vmul.f32 %v4314_v31, %v4377_v33  ;;  %v2442_v48 = vmul.f32 %v4314_v31, %v4379_v10 }
 0x54c   :  { %v2443_v17 = vmul.f32 %v4314_v31, %v4381_v39  ;;  %v2444_v18 = vmul.f32 %v4314_v31, %v4383_v4  ;;  %v2445_v19 = vmul.f32 %v4314_v31, %v4385_v21  ;;  %v2446_v34 = vmul.f32 %v4314_v31, %v4387_v13 }
 0x54d   :  { %v2447_v23 = vmul.f32 %v4314_v31, %v4389_v43  ;;  %v2448_v12 = vmul.f32 %v4314_v31, %v4391_v44  ;;  %v2449_v53 = vmul.f32 %v4314_v31, %v4393_v24  ;;  %v2450_v27 = vmul.f32 %v4314_v31, %v4395_v54 }
 0x54e   :  { %v2451_v4 = vmul.f32 %v4314_v31, %v4397_v49  ;;  %v2452_v21 = vsel %vm2387_vm6, %v4335_v15, %v2420_v57  ;;  %v2453_v43 = vsel %vm2388_vm9, %v4337_v46, %v2421_v37  ;;  %v2454_v44 = vsel %vm2389_vm10, %v4339_v58, %v2422_v14 }
 0x54f   :  { %v2455_v24 = vsel %vm2390_vm11, %v4341_v60, %v2423_v41  ;;  %v2456_v31 = vsel %vm2391_vm12, %v4343_v3, %v2424_v28  ;;  %v2457_v15 = vsel %vm2392_vm13, %v4345_v59, %v2425_v26  ;;  %v2458_v46 = vsel %vm2393_vm14, %v4347_v0, %v2426_v52 }
 0x550   :  { %v2459_v58 = vsel %vm2394_vm15, %v4349_v25, %v2427_v42  ;;  %vm4759_vm6 = vcmask 343040   ;;  %v2460_v60 = vsel %vm2395_vm0, %v4351_v22, %v2428_v47  ;;  %v2461_v3 = vsel %vm2396_vm1, %v4353_v20, %v2429_v40 }
 0x551   :  { %2484 = vst.msk [vmem:[%s4736_s17] sm:$0xff] %vm4759_vm6, %v2452_v21  ;;  %vm4760_vm9 = vmmov %vm4759_vm6  ;;  %v2462_v59 = vsel %vm2397_vm2, %v4355_v1, %v2430_v45  ;;  %v2463_v0 = vsel %vm2398_vm3, %v4357_v9, %v2431_v56  ;;  %vm4767_vm0 = vcmp.ge.f32.partialorder %v4359_v50, 0.0  ;;  %vm4768_vm1 = vcmp.ge.f32.partialorder %v4361_v36, 0.0  ;;  %v4795_v21 = vld [vmem:[#allocation7_spill] sm:$0xff] }
 0x552   :  { %2485 = vst.msk [vmem:[%s4736_s17 + $0x8] sm:$0xff] %vm4760_vm9, %v2453_v43  ;;  %vm4761_vm10 = vmmov %vm4759_vm6  ;;  %v2464_v25 = vsel %vm4767_vm0, %v4359_v50, %v2432_v35  ;;  %v2465_v22 = vsel %vm4768_vm1, %v4361_v36, %v2433_v29  ;;  %vm4769_vm2 = vcmp.ge.f32.partialorder %v4363_v61, 0.0  ;;  %vm4770_vm3 = vcmp.ge.f32.partialorder %v4365_v63, 0.0 }
 0x553   :  { %2486 = vst.msk [vmem:[%s4736_s17 + $0x10] sm:$0xff] %vm4761_vm10, %v2454_v44  ;;  %vm4762_vm11 = vmmov %vm4759_vm6  ;;  %v2466_v20 = vsel %vm4769_vm2, %v4363_v61, %v2434_v32  ;;  %v2467_v1 = vsel %vm4770_vm3, %v4365_v63, %v2435_v62  ;;  %v2482_v37 = vsel %vm2417_vm7, %v4395_v54, %v2450_v27  ;;  %v2483_v14 = vsel %vm2418_vm8, %v4397_v49, %v2451_v4 }
 0x554   :  { %2487 = vst.msk [vmem:[%s4736_s17 + $0x18] sm:$0xff] %vm4762_vm11, %v2455_v24  ;;  %vm4763_vm12 = vmmov %vm4759_vm6  ;;  %v4802_v24 = vld [vmem:[#allocation9_spill] sm:$0xff] }
 0x555   :  { %2488 = vst.msk [vmem:[%s4736_s17 + $0x20] sm:$0xff] %vm4763_vm12, %v2456_v31  ;;  %vm4764_vm13 = vmmov %vm4759_vm6  ;;  %vm4774_vm12 = vcmp.ge.f32.partialorder %v4367_v38, 0.0  ;;  %v2481_v57 = vsel %vm2416_vm4, %v4802_v24, %v2449_v53 }
 0x556   :  { %2489 = vst.msk [vmem:[%s4736_s17 + $0x28] sm:$0xff] %vm4764_vm13, %v2457_v15  ;;  %vm4765_vm14 = vmmov %vm4759_vm6  ;;  %v2468_v9 = vsel %vm4774_vm12, %v4367_v38, %v2436_v6  ;;  %vm4775_vm13 = vcmp.ge.f32.partialorder %v4369_v8, 0.0 }
 0x557   :  { %2490 = vst.msk [vmem:[%s4736_s17 + $0x30] sm:$0xff] %vm4765_vm14, %v2458_v46  ;;  %vm4766_vm15 = vmmov %vm4759_vm6  ;;  %v2469_v50 = vsel %vm4775_vm13, %v4369_v8, %v2437_v30  ;;  %vm4776_vm14 = vcmp.ge.f32.partialorder %v4371_v5, 0.0 }
 0x558   :  { %2491 = vst.msk [vmem:[%s4736_s17 + $0x38] sm:$0xff] %vm4766_vm15, %v2459_v58  ;;  %vm4771_vm9 = vmmov %vm4759_vm6  ;;  %v2470_v36 = vsel %vm4776_vm14, %v4371_v5, %v2438_v2  ;;  %vm4777_vm15 = vcmp.ge.f32.partialorder %v4373_v55, 0.0 }
 0x559   :  { %2492 = vst.msk [vmem:[%s4736_s17 + $0x40] sm:$0xff] %vm4759_vm6, %v2460_v60  ;;  %vm4772_vm10 = vmmov %vm4759_vm6  ;;  %v2471_v61 = vsel %vm4777_vm15, %v4373_v55, %v2439_v11  ;;  %v4790_v55 = vld [vmem:[#allocation5_spill] sm:$0xff] }
 0x55a   :  { %2493 = vst.msk [vmem:[%s4736_s17 + $0x48] sm:$0xff] %vm4771_vm9, %v2461_v3  ;;  %vm4773_vm11 = vmmov %vm4759_vm6  ;;  %vm4783_vm9 = vcmp.ge.f32.partialorder %v4377_v33, 0.0 }
 0x55b   :  { %2494 = vst.msk [vmem:[%s4736_s17 + $0x50] sm:$0xff] %vm4772_vm10, %v2462_v59  ;;  %vm4778_vm0 = vmmov %vm4759_vm6  ;;  %vm4782_vm6 = vcmp.ge.f32.partialorder %v4375_v51, 0.0  ;;  %v2473_v38 = vsel %vm4783_vm9, %v4377_v33, %v2441_v16  ;;  %vm4784_vm10 = vcmp.ge.f32.partialorder %v4379_v10, 0.0  ;;  %v4792_v33 = vld [vmem:[#allocation6_spill] sm:$0xff] }
 0x55c   :  { %2495 = vst.msk [vmem:[%s4736_s17 + $0x58] sm:$0xff] %vm4773_vm11, %v2463_v0  ;;  %vm4779_vm1 = vmmov %vm4778_vm0  ;;  %v2472_v63 = vsel %vm4782_vm6, %v4375_v51, %v2440_v7  ;;  %v2474_v8 = vsel %vm4784_vm10, %v4379_v10, %v2442_v48  ;;  %vm4785_vm11 = vcmp.ge.f32.partialorder %v4381_v39, 0.0 }
 0x55d   :  { %2496 = vst.msk [vmem:[%s4736_s17 + $0x60] sm:$0xff] %vm4778_vm0, %v2464_v25  ;;  %vm4780_vm2 = vmmov %vm4778_vm0  ;;  %v2475_v5 = vsel %vm4785_vm11, %v4381_v39, %v2443_v17 }
 0x55e   :  { %2497 = vst.msk [vmem:[%s4736_s17 + $0x68] sm:$0xff] %vm4779_vm1, %v2465_v22  ;;  %vm4781_vm3 = vmmov %vm4778_vm0  ;;  %vm4793_vm1 = vcmp.ge.f32.partialorder %v4792_v33, 0.0 }
 0x55f   :  { %2498 = vst.msk [vmem:[%s4736_s17 + $0x70] sm:$0xff] %vm4780_vm2, %v2466_v20  ;;  %vm4786_vm12 = vmmov %vm4778_vm0  ;;  %v2477_v10 = vsel %vm4793_vm1, %v4792_v33, %v2445_v19  ;;  %vm4794_vm2 = vcmp.ge.f32.partialorder %v4387_v13, 0.0 }
 0x560   :  { %2499 = vst.msk [vmem:[%s4736_s17 + $0x78] sm:$0xff] %vm4781_vm3, %v2467_v1  ;;  %vm4787_vm13 = vmmov %vm4778_vm0  ;;  %v2478_v39 = vsel %vm4794_vm2, %v4387_v13, %v2446_v34  ;;  %vm4796_vm3 = vcmp.ge.f32.partialorder %v4795_v21, 0.0  ;;  %v4801_v13 = vld [vmem:[#allocation8_spill] sm:$0xff] }
 0x561   :  { %2500 = vst.msk [vmem:[%s4736_s17 + $0x80] sm:$0xff] %vm4786_vm12, %v2468_v9  ;;  %vm4788_vm14 = vmmov %vm4778_vm0  ;;  %v2479_v43 = vsel %vm4796_vm3, %v4795_v21, %v2447_v23  ;;  %v2480_v44 = vsel %vm2415_vm5, %v4801_v13, %v2448_v12 }
 0x562   :  { %2501 = vst.msk [vmem:[%s4736_s17 + $0x88] sm:$0xff] %vm4787_vm13, %v2469_v50  ;;  %vm4789_vm15 = vmmov %vm4778_vm0  ;;  %vm4791_vm0 = vcmp.ge.f32.partialorder %v4790_v55, 0.0 }
 0x563   :  { %2502 = vst.msk [vmem:[%s4736_s17 + $0x90] sm:$0xff] %vm4788_vm14, %v2470_v36  ;;  %v2476_v51 = vsel %vm4791_vm0, %v4790_v55, %v2444_v18  ;;  %vm4797_vm6 = vmmov %vm4786_vm12 }
 0x564   :  { %2503 = vst.msk [vmem:[%s4736_s17 + $0x98] sm:$0xff] %vm4789_vm15, %v2471_v61  ;;  %vm4798_vm9 = vmmov %vm4797_vm6 }
 0x565   :  { %2504 = vst.msk [vmem:[%s4736_s17 + $0xa0] sm:$0xff] %vm4797_vm6, %v2472_v63  ;;  %vm4799_vm10 = vmmov %vm4797_vm6 }
 0x566   :  { %2505 = vst.msk [vmem:[%s4736_s17 + $0xa8] sm:$0xff] %vm4798_vm9, %v2473_v38  ;;  %vm4800_vm11 = vmmov %vm4797_vm6 }
 0x567   :  { %2506 = vst.msk [vmem:[%s4736_s17 + $0xb0] sm:$0xff] %vm4799_vm10, %v2474_v8  ;;  %vm4803_vm12 = vmmov %vm4797_vm6 }
 0x568   :  { %2507 = vst.msk [vmem:[%s4736_s17 + $0xb8] sm:$0xff] %vm4800_vm11, %v2475_v5  ;;  %vm4804_vm13 = vmmov %vm4797_vm6 }
 0x569   :  { %2508 = vst.msk [vmem:[%s4736_s17 + $0xc0] sm:$0xff] %vm4803_vm12, %v2476_v51  ;;  %vm4805_vm5 = vmmov %vm4797_vm6 }
 0x56a   :  { %2509 = vst.msk [vmem:[%s4736_s17 + $0xc8] sm:$0xff] %vm4804_vm13, %v2477_v10  ;;  %vm4806_vm4 = vmmov %vm4805_vm5 }
 0x56b   :  { %2510 = vst.msk [vmem:[%s4736_s17 + $0xd0] sm:$0xff] %vm4805_vm5, %v2478_v39  ;;  %vm4807_vm8 = vmmov %vm4806_vm4 }
 0x56c   :  { %2511 = vst.msk [vmem:[%s4736_s17 + $0xd8] sm:$0xff] %vm4806_vm4, %v2479_v43  ;;  %vm4808_vm7 = vmmov %vm4806_vm4 }
 0x56d   :  { %2512 = vst.msk [vmem:[%s4736_s17 + $0xe0] sm:$0xff] %vm4807_vm8, %v2480_v44  ;;  %vm4809_vm14 = vmmov %vm4806_vm4 }
 0x56e   :  { %2513 = vst.msk [vmem:[%s4736_s17 + $0xe8] sm:$0xff] %vm4808_vm7, %v2481_v57  ;;  %vm4810_vm15 = vmmov %vm4806_vm4 }
 0x56f   :  { %2514 = vst.msk [vmem:[%s4736_s17 + $0xf0] sm:$0xff] %vm4809_vm14, %v2482_v37 }
 0x570   :  { %2515 = vst.msk [vmem:[%s4736_s17 + $0xf8] sm:$0xff] %vm4810_vm15, %v2483_v14 }

</bundles_post_ra>
